<compile_context>
chip_gen: v5e
topology: v5e:2x2
jax: 0.10.0
libtpu: 0.0.40
codegen_flags: <defaults>
</compile_context>

<pallas_src>
import jax
import jax.numpy as jnp
from jax import lax
from jax.experimental import pallas as pl
from jax.experimental.pallas import tpu as pltpu


def _cnn_fused_kernel(x_ref,
                      cm1_ref, cb1_ref, pr1_ref, pc1_ref,
                      cm2_ref, cb2_ref, pr2_ref, pc2_ref,
                      cm3_ref, cb3_ref, pr3_ref, pc3_ref,
                      w1p_ref, b1_ref, w2p_ref, b2_ref,
                      o_ref):
    f32 = jnp.float32

    def conv_relu(xp, cm_ref, cb_ref):
        # xp: (H+2, Cin*W) with zero rows 0 and H+1; cm_ref: (3, Cin*W, Cout*W) banded
        # weights; cb_ref: (1, Cout*W) bias broadcast row.
        h = xp.shape[0] - 2
        acc = jnp.dot(xp[0:h, :], cm_ref[0], preferred_element_type=f32)
        acc = acc + jnp.dot(xp[1:h + 1, :], cm_ref[1], preferred_element_type=f32)
        acc = acc + jnp.dot(xp[2:h + 2, :], cm_ref[2], preferred_element_type=f32)
        return jnp.maximum(acc + cb_ref[...], 0.0)            # (H, Cout*W)

    def maxpool(a, pr_ref, pc_ref):
        # a: (H, C*W); pr_ref: (2, R, H) even/odd row selectors (R = Ho or Ho+2, the
        # +2 variant re-inserts zero padding rows for the next conv);
        # pc_ref: (2, C*W, C*Wo) even/odd column selectors (block-diagonal per channel).
        rmax = jnp.maximum(jnp.dot(pr_ref[0], a, preferred_element_type=f32),
                           jnp.dot(pr_ref[1], a, preferred_element_type=f32))
        return jnp.maximum(jnp.dot(rmax, pc_ref[0], preferred_element_type=f32),
                           jnp.dot(rmax, pc_ref[1], preferred_element_type=f32))

    x0 = x_ref[0]                                    # (66, Cin*64)
    a1 = conv_relu(x0, cm1_ref, cb1_ref)             # (64, 4*64)
    x1 = maxpool(a1, pr1_ref, pc1_ref)               # (34, 4*32)  rows 0/33 are zero pad
    a2 = conv_relu(x1, cm2_ref, cb2_ref)             # (32, 6*32)
    x2 = maxpool(a2, pr2_ref, pc2_ref)               # (18, 6*16)
    a3 = conv_relu(x2, cm3_ref, cb3_ref)             # (16, 8*16)
    x3 = maxpool(a3, pr3_ref, pc3_ref)               # (8, 8*8)    no pad rows

    # fc1: contract the (yo, c*8+xo) feature map against pre-permuted weights.
    h = b1_ref[...]                                  # (1, 128)
    for yo in range(x3.shape[0]):
        h = h + jnp.dot(x3[yo:yo + 1, :], w1p_ref[yo], preferred_element_type=f32)
    h = jnp.maximum(h, 0.0)
    # TODO(synk): nn.Dropout(p=0.0) is an identity at inference; intentionally omitted.
    o_ref[0] = jnp.dot(h, w2p_ref[...], preferred_element_type=f32) + b2_ref[...]


def _conv_band_mats(w, width):
    """(Cout, Cin, 3, 3) OIHW conv weights -> (3, Cin*width, Cout*width) banded matrices.

    M_dy[ci*W + xi, co*W + xo] = w[co, ci, dy, xi - xo + 1] when |xi - xo| <= 1, else 0.
    Left/right zero-padding of the conv is encoded by the band staying inside each
    channel block.
    """
    w = w.astype(jnp.float32)
    cout, cin = w.shape[0], w.shape[1]
    xi = jnp.arange(width)[:, None]
    xo = jnp.arange(width)[None, :]
    mats = []
    for dy in range(3):
        m = jnp.zeros((cin, width, cout, width), jnp.float32)
        for dx in range(3):
            sel = (xi - xo == dx - 1).astype(jnp.float32)                 # (width, width)
            m = m + sel[None, :, None, :] * w[:, :, dy, dx].T[:, None, :, None]
        mats.append(m.reshape(cin * width, cout * width))
    return jnp.stack(mats)


def _pool_mats(h, w, c, pad_out):
    """Even/odd row & column selectors for a 2x2 max-pool on an (h, c*w) slab."""
    ho, wo = h // 2, w // 2
    off = 1 if pad_out else 0
    rows = ho + 2 * off
    r = jnp.arange(rows)[:, None]
    y = jnp.arange(h)[None, :]
    valid = (r >= off) & (r < ho + off)
    re = ((y == 2 * (r - off)) & valid).astype(jnp.float32)               # (rows, h)
    ro = ((y == 2 * (r - off) + 1) & valid).astype(jnp.float32)
    l = jnp.arange(c * w)[:, None]
    lo = jnp.arange(c * wo)[None, :]
    same_c = (l // w) == (lo // wo)
    ce = (same_c & ((l % w) == 2 * (lo % wo))).astype(jnp.float32)        # (c*w, c*wo)
    co = (same_c & ((l % w) == 2 * (lo % wo) + 1)).astype(jnp.float32)
    return jnp.stack([re, ro]), jnp.stack([ce, co])


@jax.jit
def cnn_forward(params, x):
    b, c1, hh, ww = x.shape            # forward pass implies 64x64 (fc1 fan-in 8*8*8)
    f32 = jnp.float32
    x = x.astype(f32)

    c2 = params["w1c"].shape[0]
    c3 = params["w2c"].shape[0]
    c4 = params["w3c"].shape[0]
    dh = params["w_fc1"].shape[0]      # 128
    nc = params["w_fc2"].shape[0]
    ncp = ((nc + 127) // 128) * 128    # lane-dense fc2 output, sliced back below

    # input image -> (B, H+2, Cin*W) with zero rows at top/bottom (tiny, done once).
    xin = jnp.transpose(x, (0, 2, 1, 3)).reshape(b, hh, c1 * ww)
    xin = jnp.pad(xin, ((0, 0), (1, 1), (0, 0)))

    cm1 = _conv_band_mats(params["w1c"], ww)
    cb1 = jnp.repeat(params["b1c"].astype(f32), ww)[None, :]
    pr1, pc1 = _pool_mats(hh, ww, c2, pad_out=True)

    h2, w2 = hh // 2, ww // 2
    cm2 = _conv_band_mats(params["w2c"], w2)
    cb2 = jnp.repeat(params["b2c"].astype(f32), w2)[None, :]
    pr2, pc2 = _pool_mats(h2, w2, c3, pad_out=True)

    h3, w3 = h2 // 2, w2 // 2
    cm3 = _conv_band_mats(params["w3c"], w3)
    cb3 = jnp.repeat(params["b3c"].astype(f32), w3)[None, :]
    pr3, pc3 = _pool_mats(h3, w3, c4, pad_out=False)

    h4, w4 = h3 // 2, w3 // 2          # 8, 8
    # w1p[yo, c*w4 + xo, j] = W_fc1[j, c*h4*w4 + yo*w4 + xo]  (torch .view C,H,W order)
    w1p = (params["w_fc1"].astype(f32)
           .reshape(dh, c4, h4, w4)
           .transpose(2, 1, 3, 0)
           .reshape(h4, c4 * w4, dh))
    b1r = params["b_fc1"].astype(f32)[None, :]
    w2p = jnp.zeros((dh, ncp), f32).at[:, :nc].set(params["w_fc2"].astype(f32).T)
    b2r = jnp.zeros((1, ncp), f32).at[0, :nc].set(params["b_fc2"].astype(f32))

    consts = [cm1, cb1, pr1, pc1, cm2, cb2, pr2, pc2, cm3, cb3, pr3, pc3,
              w1p, b1r, w2p, b2r]

    def _const_spec(a):
        nd = a.ndim
        return pl.BlockSpec(a.shape, lambda i: (0,) * nd)

    out = pl.pallas_call(
        _cnn_fused_kernel,
        out_shape=jax.ShapeDtypeStruct((b, 1, ncp), f32),
        grid=(b,),
        in_specs=[pl.BlockSpec((1, hh + 2, c1 * ww), lambda i: (i, 0, 0))]
                 + [_const_spec(a) for a in consts],
        out_specs=pl.BlockSpec((1, 1, ncp), lambda i: (i, 0, 0)),
        compiler_params=pltpu.CompilerParams(dimension_semantics=("parallel",)),
    )(xin, *consts)

    return out.reshape(b, ncp)[:, :nc]


def init_params(key, num_classes=10, img_channels=1):
    def uni(k, shape, fan_in):
        bound = 1.0 / (fan_in ** 0.5)
        return jax.random.uniform(k, shape, jnp.float32, -bound, bound)

    ks = jax.random.split(key, 10)
    return {
        "w1c": uni(ks[0], (4, img_channels, 3, 3), img_channels * 9),
        "b1c": uni(ks[1], (4,), img_channels * 9),
        "w2c": uni(ks[2], (6, 4, 3, 3), 4 * 9),
        "b2c": uni(ks[3], (6,), 4 * 9),
        "w3c": uni(ks[4], (8, 6, 3, 3), 6 * 9),
        "b3c": uni(ks[5], (8,), 6 * 9),
        "w_fc1": uni(ks[6], (128, 8 * 8 * 8), 8 * 8 * 8),
        "b_fc1": uni(ks[7], (128,), 8 * 8 * 8),
        "w_fc2": uni(ks[8], (num_classes, 128), 128),
        "b_fc2": uni(ks[9], (num_classes,), 128),
    }


def cnn_forward_ref(params, x):
    """Pure-JAX reference for validation."""
    def block(x, w, b):
        y = lax.conv_general_dilated(
            x, w, (1, 1), ((1, 1), (1, 1)),
            dimension_numbers=("NCHW", "OIHW", "NCHW"),
            precision=lax.Precision.HIGHEST)
        y = jax.nn.relu(y + b[None, :, None, None])
        return lax.reduce_window(y, -jnp.inf, lax.max, (1, 1, 2, 2), (1, 1, 2, 2), "VALID")

    x = block(x, params["w1c"], params["b1c"])
    x = block(x, params["w2c"], params["b2c"])
    x = block(x, params["w3c"], params["b3c"])
    x = x.reshape(x.shape[0], -1)
    h = jax.nn.relu(jnp.dot(x, params["w_fc1"].T, precision=lax.Precision.HIGHEST)
                    + params["b_fc1"])
    return jnp.dot(h, params["w_fc2"].T, precision=lax.Precision.HIGHEST) + params["b_fc2"]


if __name__ == "__main__":
    key = jax.random.PRNGKey(0)
    pkey, xkey = jax.random.split(key)
    num_classes = 10
    params = init_params(pkey, num_classes=num_classes, img_channels=1)
    # Three 2x pools down to an 8x8x8 feature map imply a 64x64 single-channel input.
    x = jax.random.normal(xkey, (2, 1, 64, 64), jnp.float32)

    out = jax.block_until_ready(cnn_forward(params, x))
    assert out.shape == (2, num_classes)

    ref = cnn_forward_ref(params, x)
    max_err = float(jnp.max(jnp.abs(out - ref)))
    # Tolerance leaves headroom for MXU f32 pass decomposition / accumulation order.
    assert max_err < 2e-2, f"mismatch vs reference: {max_err}"

    print("KERNEL_OK")
</pallas_src>

<mosaic_0001>
module attributes {stable_mosaic.version = 11 : i64} {
  func.func @_cnn_fused_kernel(%arg0: i32, %arg1: memref<1x66x64xf32, #tpu.memory_space<vmem>>, %arg2: memref<3x64x256xf32, #tpu.memory_space<vmem>>, %arg3: memref<1x256xf32, #tpu.memory_space<vmem>>, %arg4: memref<2x34x64xf32, #tpu.memory_space<vmem>>, %arg5: memref<2x256x128xf32, #tpu.memory_space<vmem>>, %arg6: memref<3x128x192xf32, #tpu.memory_space<vmem>>, %arg7: memref<1x192xf32, #tpu.memory_space<vmem>>, %arg8: memref<2x18x32xf32, #tpu.memory_space<vmem>>, %arg9: memref<2x192x96xf32, #tpu.memory_space<vmem>>, %arg10: memref<3x96x128xf32, #tpu.memory_space<vmem>>, %arg11: memref<1x128xf32, #tpu.memory_space<vmem>>, %arg12: memref<2x8x16xf32, #tpu.memory_space<vmem>>, %arg13: memref<2x128x64xf32, #tpu.memory_space<vmem>>, %arg14: memref<8x64x128xf32, #tpu.memory_space<vmem>>, %arg15: memref<1x128xf32, #tpu.memory_space<vmem>>, %arg16: memref<128x128xf32, #tpu.memory_space<vmem>>, %arg17: memref<1x128xf32, #tpu.memory_space<vmem>>, %arg18: memref<1x1x128xf32, #tpu.memory_space<vmem>>) attributes {dimension_semantics = [#tpu.dimension_semantics<parallel>], iteration_bounds = array<i64: 2>, scalar_prefetch = 0 : i64, scratch_operands = 0 : i64, tpu.core_type = #tpu.core_type<tc>, window_params = [{transform_indices = @transform_0, window_bounds = array<i64: 1, 66, 64>}, {pipeline_mode = #tpu.pipeline_mode<synchronous>, transform_indices = @transform_1, window_bounds = array<i64: 3, 64, 256>}, {pipeline_mode = #tpu.pipeline_mode<synchronous>, transform_indices = @transform_2, window_bounds = array<i64: 1, 256>}, {pipeline_mode = #tpu.pipeline_mode<synchronous>, transform_indices = @transform_3, window_bounds = array<i64: 2, 34, 64>}, {pipeline_mode = #tpu.pipeline_mode<synchronous>, transform_indices = @transform_4, window_bounds = array<i64: 2, 256, 128>}, {pipeline_mode = #tpu.pipeline_mode<synchronous>, transform_indices = @transform_5, window_bounds = array<i64: 3, 128, 192>}, {pipeline_mode = #tpu.pipeline_mode<synchronous>, transform_indices = @transform_6, window_bounds = array<i64: 1, 192>}, {pipeline_mode = #tpu.pipeline_mode<synchronous>, transform_indices = @transform_7, window_bounds = array<i64: 2, 18, 32>}, {pipeline_mode = #tpu.pipeline_mode<synchronous>, transform_indices = @transform_8, window_bounds = array<i64: 2, 192, 96>}, {pipeline_mode = #tpu.pipeline_mode<synchronous>, transform_indices = @transform_9, window_bounds = array<i64: 3, 96, 128>}, {pipeline_mode = #tpu.pipeline_mode<synchronous>, transform_indices = @transform_10, window_bounds = array<i64: 1, 128>}, {pipeline_mode = #tpu.pipeline_mode<synchronous>, transform_indices = @transform_11, window_bounds = array<i64: 2, 8, 16>}, {pipeline_mode = #tpu.pipeline_mode<synchronous>, transform_indices = @transform_12, window_bounds = array<i64: 2, 128, 64>}, {pipeline_mode = #tpu.pipeline_mode<synchronous>, transform_indices = @transform_13, window_bounds = array<i64: 8, 64, 128>}, {pipeline_mode = #tpu.pipeline_mode<synchronous>, transform_indices = @transform_14, window_bounds = array<i64: 1, 128>}, {pipeline_mode = #tpu.pipeline_mode<synchronous>, transform_indices = @transform_15, window_bounds = array<i64: 128, 128>}, {pipeline_mode = #tpu.pipeline_mode<synchronous>, transform_indices = @transform_16, window_bounds = array<i64: 1, 128>}, {transform_indices = @transform_17, window_bounds = array<i64: 1, 1, 128>}]} {
    %c0 = arith.constant 0 : index
    %c0_0 = arith.constant 0 : index
    %c0_1 = arith.constant 0 : index
    %0 = vector.load %arg1[%c0, %c0_0, %c0_1] : memref<1x66x64xf32, #tpu.memory_space<vmem>>, vector<1x66x64xf32>
    %1 = vector.shape_cast %0 : vector<1x66x64xf32> to vector<66x64xf32>
    %2 = vector.extract_strided_slice %1 {offsets = [0, 0], sizes = [64, 64], strides = [1, 1]} : vector<66x64xf32> to vector<64x64xf32>
    %c0_2 = arith.constant 0 : index
    %c0_3 = arith.constant 0 : index
    %c0_4 = arith.constant 0 : index
    %3 = vector.load %arg2[%c0_2, %c0_3, %c0_4] : memref<3x64x256xf32, #tpu.memory_space<vmem>>, vector<1x64x256xf32>
    %4 = vector.shape_cast %3 : vector<1x64x256xf32> to vector<64x256xf32>
    %cst = arith.constant dense<0.000000e+00> : vector<64x256xf32>
    %5 = tpu.matmul %2, %4, %cst {dimension_numbers = #tpu.dot_dimension_numbers<[1], [0], [0], [1], [0, 0, 1, 1], [], []>} : vector<64x64xf32>, vector<64x256xf32>, vector<64x256xf32> -> vector<64x256xf32>
    %6 = vector.extract_strided_slice %1 {offsets = [1, 0], sizes = [64, 64], strides = [1, 1]} : vector<66x64xf32> to vector<64x64xf32>
    %c1 = arith.constant 1 : index
    %c0_5 = arith.constant 0 : index
    %c0_6 = arith.constant 0 : index
    %7 = vector.load %arg2[%c1, %c0_5, %c0_6] : memref<3x64x256xf32, #tpu.memory_space<vmem>>, vector<1x64x256xf32>
    %8 = vector.shape_cast %7 : vector<1x64x256xf32> to vector<64x256xf32>
    %cst_7 = arith.constant dense<0.000000e+00> : vector<64x256xf32>
    %9 = tpu.matmul %6, %8, %cst_7 {dimension_numbers = #tpu.dot_dimension_numbers<[1], [0], [0], [1], [0, 0, 1, 1], [], []>} : vector<64x64xf32>, vector<64x256xf32>, vector<64x256xf32> -> vector<64x256xf32>
    %10 = arith.addf %5, %9 : vector<64x256xf32>
    %11 = vector.extract_strided_slice %1 {offsets = [2, 0], sizes = [64, 64], strides = [1, 1]} : vector<66x64xf32> to vector<64x64xf32>
    %c2 = arith.constant 2 : index
    %c0_8 = arith.constant 0 : index
    %c0_9 = arith.constant 0 : index
    %12 = vector.load %arg2[%c2, %c0_8, %c0_9] : memref<3x64x256xf32, #tpu.memory_space<vmem>>, vector<1x64x256xf32>
    %13 = vector.shape_cast %12 : vector<1x64x256xf32> to vector<64x256xf32>
    %cst_10 = arith.constant dense<0.000000e+00> : vector<64x256xf32>
    %14 = tpu.matmul %11, %13, %cst_10 {dimension_numbers = #tpu.dot_dimension_numbers<[1], [0], [0], [1], [0, 0, 1, 1], [], []>} : vector<64x64xf32>, vector<64x256xf32>, vector<64x256xf32> -> vector<64x256xf32>
    %15 = arith.addf %10, %14 : vector<64x256xf32>
    %c0_11 = arith.constant 0 : index
    %c0_12 = arith.constant 0 : index
    %16 = vector.load %arg3[%c0_11, %c0_12] : memref<1x256xf32, #tpu.memory_space<vmem>>, vector<1x256xf32>
    %17 = vector.broadcast %16 : vector<1x256xf32> to vector<64x256xf32>
    %18 = arith.addf %15, %17 : vector<64x256xf32>
    %cst_13 = arith.constant 0.000000e+00 : f32
    %19 = vector.broadcast %cst_13 : f32 to vector<64x256xf32>
    %20 = arith.maximumf %18, %19 : vector<64x256xf32>
    %c0_14 = arith.constant 0 : index
    %c0_15 = arith.constant 0 : index
    %c0_16 = arith.constant 0 : index
    %21 = vector.load %arg4[%c0_14, %c0_15, %c0_16] : memref<2x34x64xf32, #tpu.memory_space<vmem>>, vector<1x34x64xf32>
    %22 = vector.shape_cast %21 : vector<1x34x64xf32> to vector<34x64xf32>
    %cst_17 = arith.constant dense<0.000000e+00> : vector<34x256xf32>
    %23 = tpu.matmul %22, %20, %cst_17 {dimension_numbers = #tpu.dot_dimension_numbers<[1], [0], [0], [1], [0, 0, 1, 1], [], []>} : vector<34x64xf32>, vector<64x256xf32>, vector<34x256xf32> -> vector<34x256xf32>
    %c1_18 = arith.constant 1 : index
    %c0_19 = arith.constant 0 : index
    %c0_20 = arith.constant 0 : index
    %24 = vector.load %arg4[%c1_18, %c0_19, %c0_20] : memref<2x34x64xf32, #tpu.memory_space<vmem>>, vector<1x34x64xf32>
    %25 = vector.shape_cast %24 : vector<1x34x64xf32> to vector<34x64xf32>
    %cst_21 = arith.constant dense<0.000000e+00> : vector<34x256xf32>
    %26 = tpu.matmul %25, %20, %cst_21 {dimension_numbers = #tpu.dot_dimension_numbers<[1], [0], [0], [1], [0, 0, 1, 1], [], []>} : vector<34x64xf32>, vector<64x256xf32>, vector<34x256xf32> -> vector<34x256xf32>
    %27 = arith.maximumf %23, %26 : vector<34x256xf32>
    %c0_22 = arith.constant 0 : index
    %c0_23 = arith.constant 0 : index
    %c0_24 = arith.constant 0 : index
    %28 = vector.load %arg5[%c0_22, %c0_23, %c0_24] : memref<2x256x128xf32, #tpu.memory_space<vmem>>, vector<1x256x128xf32>
    %29 = vector.shape_cast %28 : vector<1x256x128xf32> to vector<256x128xf32>
    %cst_25 = arith.constant dense<0.000000e+00> : vector<34x128xf32>
    %30 = tpu.matmul %27, %29, %cst_25 {dimension_numbers = #tpu.dot_dimension_numbers<[1], [0], [0], [1], [0, 0, 1, 1], [], []>} : vector<34x256xf32>, vector<256x128xf32>, vector<34x128xf32> -> vector<34x128xf32>
    %c1_26 = arith.constant 1 : index
    %c0_27 = arith.constant 0 : index
    %c0_28 = arith.constant 0 : index
    %31 = vector.load %arg5[%c1_26, %c0_27, %c0_28] : memref<2x256x128xf32, #tpu.memory_space<vmem>>, vector<1x256x128xf32>
    %32 = vector.shape_cast %31 : vector<1x256x128xf32> to vector<256x128xf32>
    %cst_29 = arith.constant dense<0.000000e+00> : vector<34x128xf32>
    %33 = tpu.matmul %27, %32, %cst_29 {dimension_numbers = #tpu.dot_dimension_numbers<[1], [0], [0], [1], [0, 0, 1, 1], [], []>} : vector<34x256xf32>, vector<256x128xf32>, vector<34x128xf32> -> vector<34x128xf32>
    %34 = arith.maximumf %30, %33 : vector<34x128xf32>
    %35 = vector.extract_strided_slice %34 {offsets = [0, 0], sizes = [32, 128], strides = [1, 1]} : vector<34x128xf32> to vector<32x128xf32>
    %c0_30 = arith.constant 0 : index
    %c0_31 = arith.constant 0 : index
    %c0_32 = arith.constant 0 : index
    %36 = vector.load %arg6[%c0_30, %c0_31, %c0_32] : memref<3x128x192xf32, #tpu.memory_space<vmem>>, vector<1x128x192xf32>
    %37 = vector.shape_cast %36 : vector<1x128x192xf32> to vector<128x192xf32>
    %cst_33 = arith.constant dense<0.000000e+00> : vector<32x192xf32>
    %38 = tpu.matmul %35, %37, %cst_33 {dimension_numbers = #tpu.dot_dimension_numbers<[1], [0], [0], [1], [0, 0, 1, 1], [], []>} : vector<32x128xf32>, vector<128x192xf32>, vector<32x192xf32> -> vector<32x192xf32>
    %39 = vector.extract_strided_slice %34 {offsets = [1, 0], sizes = [32, 128], strides = [1, 1]} : vector<34x128xf32> to vector<32x128xf32>
    %c1_34 = arith.constant 1 : index
    %c0_35 = arith.constant 0 : index
    %c0_36 = arith.constant 0 : index
    %40 = vector.load %arg6[%c1_34, %c0_35, %c0_36] : memref<3x128x192xf32, #tpu.memory_space<vmem>>, vector<1x128x192xf32>
    %41 = vector.shape_cast %40 : vector<1x128x192xf32> to vector<128x192xf32>
    %cst_37 = arith.constant dense<0.000000e+00> : vector<32x192xf32>
    %42 = tpu.matmul %39, %41, %cst_37 {dimension_numbers = #tpu.dot_dimension_numbers<[1], [0], [0], [1], [0, 0, 1, 1], [], []>} : vector<32x128xf32>, vector<128x192xf32>, vector<32x192xf32> -> vector<32x192xf32>
    %43 = arith.addf %38, %42 : vector<32x192xf32>
    %44 = vector.extract_strided_slice %34 {offsets = [2, 0], sizes = [32, 128], strides = [1, 1]} : vector<34x128xf32> to vector<32x128xf32>
    %c2_38 = arith.constant 2 : index
    %c0_39 = arith.constant 0 : index
    %c0_40 = arith.constant 0 : index
    %45 = vector.load %arg6[%c2_38, %c0_39, %c0_40] : memref<3x128x192xf32, #tpu.memory_space<vmem>>, vector<1x128x192xf32>
    %46 = vector.shape_cast %45 : vector<1x128x192xf32> to vector<128x192xf32>
    %cst_41 = arith.constant dense<0.000000e+00> : vector<32x192xf32>
    %47 = tpu.matmul %44, %46, %cst_41 {dimension_numbers = #tpu.dot_dimension_numbers<[1], [0], [0], [1], [0, 0, 1, 1], [], []>} : vector<32x128xf32>, vector<128x192xf32>, vector<32x192xf32> -> vector<32x192xf32>
    %48 = arith.addf %43, %47 : vector<32x192xf32>
    %c0_42 = arith.constant 0 : index
    %c0_43 = arith.constant 0 : index
    %49 = vector.load %arg7[%c0_42, %c0_43] : memref<1x192xf32, #tpu.memory_space<vmem>>, vector<1x192xf32>
    %50 = vector.broadcast %49 : vector<1x192xf32> to vector<32x192xf32>
    %51 = arith.addf %48, %50 : vector<32x192xf32>
    %cst_44 = arith.constant 0.000000e+00 : f32
    %52 = vector.broadcast %cst_44 : f32 to vector<32x192xf32>
    %53 = arith.maximumf %51, %52 : vector<32x192xf32>
    %c0_45 = arith.constant 0 : index
    %c0_46 = arith.constant 0 : index
    %c0_47 = arith.constant 0 : index
    %54 = vector.load %arg8[%c0_45, %c0_46, %c0_47] : memref<2x18x32xf32, #tpu.memory_space<vmem>>, vector<1x18x32xf32>
    %55 = vector.shape_cast %54 : vector<1x18x32xf32> to vector<18x32xf32>
    %cst_48 = arith.constant dense<0.000000e+00> : vector<18x192xf32>
    %56 = tpu.matmul %55, %53, %cst_48 {dimension_numbers = #tpu.dot_dimension_numbers<[1], [0], [0], [1], [0, 0, 1, 1], [], []>} : vector<18x32xf32>, vector<32x192xf32>, vector<18x192xf32> -> vector<18x192xf32>
    %c1_49 = arith.constant 1 : index
    %c0_50 = arith.constant 0 : index
    %c0_51 = arith.constant 0 : index
    %57 = vector.load %arg8[%c1_49, %c0_50, %c0_51] : memref<2x18x32xf32, #tpu.memory_space<vmem>>, vector<1x18x32xf32>
    %58 = vector.shape_cast %57 : vector<1x18x32xf32> to vector<18x32xf32>
    %cst_52 = arith.constant dense<0.000000e+00> : vector<18x192xf32>
    %59 = tpu.matmul %58, %53, %cst_52 {dimension_numbers = #tpu.dot_dimension_numbers<[1], [0], [0], [1], [0, 0, 1, 1], [], []>} : vector<18x32xf32>, vector<32x192xf32>, vector<18x192xf32> -> vector<18x192xf32>
    %60 = arith.maximumf %56, %59 : vector<18x192xf32>
    %c0_53 = arith.constant 0 : index
    %c0_54 = arith.constant 0 : index
    %c0_55 = arith.constant 0 : index
    %61 = vector.load %arg9[%c0_53, %c0_54, %c0_55] : memref<2x192x96xf32, #tpu.memory_space<vmem>>, vector<1x192x96xf32>
    %62 = vector.shape_cast %61 : vector<1x192x96xf32> to vector<192x96xf32>
    %cst_56 = arith.constant dense<0.000000e+00> : vector<18x96xf32>
    %63 = tpu.matmul %60, %62, %cst_56 {dimension_numbers = #tpu.dot_dimension_numbers<[1], [0], [0], [1], [0, 0, 1, 1], [], []>} : vector<18x192xf32>, vector<192x96xf32>, vector<18x96xf32> -> vector<18x96xf32>
    %c1_57 = arith.constant 1 : index
    %c0_58 = arith.constant 0 : index
    %c0_59 = arith.constant 0 : index
    %64 = vector.load %arg9[%c1_57, %c0_58, %c0_59] : memref<2x192x96xf32, #tpu.memory_space<vmem>>, vector<1x192x96xf32>
    %65 = vector.shape_cast %64 : vector<1x192x96xf32> to vector<192x96xf32>
    %cst_60 = arith.constant dense<0.000000e+00> : vector<18x96xf32>
    %66 = tpu.matmul %60, %65, %cst_60 {dimension_numbers = #tpu.dot_dimension_numbers<[1], [0], [0], [1], [0, 0, 1, 1], [], []>} : vector<18x192xf32>, vector<192x96xf32>, vector<18x96xf32> -> vector<18x96xf32>
    %67 = arith.maximumf %63, %66 : vector<18x96xf32>
    %68 = vector.extract_strided_slice %67 {offsets = [0, 0], sizes = [16, 96], strides = [1, 1]} : vector<18x96xf32> to vector<16x96xf32>
    %c0_61 = arith.constant 0 : index
    %c0_62 = arith.constant 0 : index
    %c0_63 = arith.constant 0 : index
    %69 = vector.load %arg10[%c0_61, %c0_62, %c0_63] : memref<3x96x128xf32, #tpu.memory_space<vmem>>, vector<1x96x128xf32>
    %70 = vector.shape_cast %69 : vector<1x96x128xf32> to vector<96x128xf32>
    %cst_64 = arith.constant dense<0.000000e+00> : vector<16x128xf32>
    %71 = tpu.matmul %68, %70, %cst_64 {dimension_numbers = #tpu.dot_dimension_numbers<[1], [0], [0], [1], [0, 0, 1, 1], [], []>} : vector<16x96xf32>, vector<96x128xf32>, vector<16x128xf32> -> vector<16x128xf32>
    %72 = vector.extract_strided_slice %67 {offsets = [1, 0], sizes = [16, 96], strides = [1, 1]} : vector<18x96xf32> to vector<16x96xf32>
    %c1_65 = arith.constant 1 : index
    %c0_66 = arith.constant 0 : index
    %c0_67 = arith.constant 0 : index
    %73 = vector.load %arg10[%c1_65, %c0_66, %c0_67] : memref<3x96x128xf32, #tpu.memory_space<vmem>>, vector<1x96x128xf32>
    %74 = vector.shape_cast %73 : vector<1x96x128xf32> to vector<96x128xf32>
    %cst_68 = arith.constant dense<0.000000e+00> : vector<16x128xf32>
    %75 = tpu.matmul %72, %74, %cst_68 {dimension_numbers = #tpu.dot_dimension_numbers<[1], [0], [0], [1], [0, 0, 1, 1], [], []>} : vector<16x96xf32>, vector<96x128xf32>, vector<16x128xf32> -> vector<16x128xf32>
    %76 = arith.addf %71, %75 : vector<16x128xf32>
    %77 = vector.extract_strided_slice %67 {offsets = [2, 0], sizes = [16, 96], strides = [1, 1]} : vector<18x96xf32> to vector<16x96xf32>
    %c2_69 = arith.constant 2 : index
    %c0_70 = arith.constant 0 : index
    %c0_71 = arith.constant 0 : index
    %78 = vector.load %arg10[%c2_69, %c0_70, %c0_71] : memref<3x96x128xf32, #tpu.memory_space<vmem>>, vector<1x96x128xf32>
    %79 = vector.shape_cast %78 : vector<1x96x128xf32> to vector<96x128xf32>
    %cst_72 = arith.constant dense<0.000000e+00> : vector<16x128xf32>
    %80 = tpu.matmul %77, %79, %cst_72 {dimension_numbers = #tpu.dot_dimension_numbers<[1], [0], [0], [1], [0, 0, 1, 1], [], []>} : vector<16x96xf32>, vector<96x128xf32>, vector<16x128xf32> -> vector<16x128xf32>
    %81 = arith.addf %76, %80 : vector<16x128xf32>
    %c0_73 = arith.constant 0 : index
    %c0_74 = arith.constant 0 : index
    %82 = vector.load %arg11[%c0_73, %c0_74] : memref<1x128xf32, #tpu.memory_space<vmem>>, vector<1x128xf32>
    %83 = vector.broadcast %82 : vector<1x128xf32> to vector<16x128xf32>
    %84 = arith.addf %81, %83 : vector<16x128xf32>
    %cst_75 = arith.constant 0.000000e+00 : f32
    %85 = vector.broadcast %cst_75 : f32 to vector<16x128xf32>
    %86 = arith.maximumf %84, %85 : vector<16x128xf32>
    %c0_76 = arith.constant 0 : index
    %c0_77 = arith.constant 0 : index
    %c0_78 = arith.constant 0 : index
    %87 = vector.load %arg12[%c0_76, %c0_77, %c0_78] : memref<2x8x16xf32, #tpu.memory_space<vmem>>, vector<1x8x16xf32>
    %88 = vector.shape_cast %87 : vector<1x8x16xf32> to vector<8x16xf32>
    %cst_79 = arith.constant dense<0.000000e+00> : vector<8x128xf32>
    %89 = tpu.matmul %88, %86, %cst_79 {dimension_numbers = #tpu.dot_dimension_numbers<[1], [0], [0], [1], [0, 0, 1, 1], [], []>} : vector<8x16xf32>, vector<16x128xf32>, vector<8x128xf32> -> vector<8x128xf32>
    %c1_80 = arith.constant 1 : index
    %c0_81 = arith.constant 0 : index
    %c0_82 = arith.constant 0 : index
    %90 = vector.load %arg12[%c1_80, %c0_81, %c0_82] : memref<2x8x16xf32, #tpu.memory_space<vmem>>, vector<1x8x16xf32>
    %91 = vector.shape_cast %90 : vector<1x8x16xf32> to vector<8x16xf32>
    %cst_83 = arith.constant dense<0.000000e+00> : vector<8x128xf32>
    %92 = tpu.matmul %91, %86, %cst_83 {dimension_numbers = #tpu.dot_dimension_numbers<[1], [0], [0], [1], [0, 0, 1, 1], [], []>} : vector<8x16xf32>, vector<16x128xf32>, vector<8x128xf32> -> vector<8x128xf32>
    %93 = arith.maximumf %89, %92 : vector<8x128xf32>
    %c0_84 = arith.constant 0 : index
    %c0_85 = arith.constant 0 : index
    %c0_86 = arith.constant 0 : index
    %94 = vector.load %arg13[%c0_84, %c0_85, %c0_86] : memref<2x128x64xf32, #tpu.memory_space<vmem>>, vector<1x128x64xf32>
    %95 = vector.shape_cast %94 : vector<1x128x64xf32> to vector<128x64xf32>
    %cst_87 = arith.constant dense<0.000000e+00> : vector<8x64xf32>
    %96 = tpu.matmul %93, %95, %cst_87 {dimension_numbers = #tpu.dot_dimension_numbers<[1], [0], [0], [1], [0, 0, 1, 1], [], []>} : vector<8x128xf32>, vector<128x64xf32>, vector<8x64xf32> -> vector<8x64xf32>
    %c1_88 = arith.constant 1 : index
    %c0_89 = arith.constant 0 : index
    %c0_90 = arith.constant 0 : index
    %97 = vector.load %arg13[%c1_88, %c0_89, %c0_90] : memref<2x128x64xf32, #tpu.memory_space<vmem>>, vector<1x128x64xf32>
    %98 = vector.shape_cast %97 : vector<1x128x64xf32> to vector<128x64xf32>
    %cst_91 = arith.constant dense<0.000000e+00> : vector<8x64xf32>
    %99 = tpu.matmul %93, %98, %cst_91 {dimension_numbers = #tpu.dot_dimension_numbers<[1], [0], [0], [1], [0, 0, 1, 1], [], []>} : vector<8x128xf32>, vector<128x64xf32>, vector<8x64xf32> -> vector<8x64xf32>
    %100 = arith.maximumf %96, %99 : vector<8x64xf32>
    %c0_92 = arith.constant 0 : index
    %c0_93 = arith.constant 0 : index
    %101 = vector.load %arg15[%c0_92, %c0_93] : memref<1x128xf32, #tpu.memory_space<vmem>>, vector<1x128xf32>
    %102 = vector.extract_strided_slice %100 {offsets = [0, 0], sizes = [1, 64], strides = [1, 1]} : vector<8x64xf32> to vector<1x64xf32>
    %c0_94 = arith.constant 0 : index
    %c0_95 = arith.constant 0 : index
    %c0_96 = arith.constant 0 : index
    %103 = vector.load %arg14[%c0_94, %c0_95, %c0_96] : memref<8x64x128xf32, #tpu.memory_space<vmem>>, vector<1x64x128xf32>
    %104 = vector.shape_cast %103 : vector<1x64x128xf32> to vector<64x128xf32>
    %cst_97 = arith.constant dense<0.000000e+00> : vector<1x128xf32>
    %105 = tpu.matmul %102, %104, %cst_97 {dimension_numbers = #tpu.dot_dimension_numbers<[1], [0], [0], [1], [0, 0, 1, 1], [], []>} : vector<1x64xf32>, vector<64x128xf32>, vector<1x128xf32> -> vector<1x128xf32>
    %106 = arith.addf %101, %105 : vector<1x128xf32>
    %107 = vector.extract_strided_slice %100 {offsets = [1, 0], sizes = [1, 64], strides = [1, 1]} : vector<8x64xf32> to vector<1x64xf32>
    %c1_98 = arith.constant 1 : index
    %c0_99 = arith.constant 0 : index
    %c0_100 = arith.constant 0 : index
    %108 = vector.load %arg14[%c1_98, %c0_99, %c0_100] : memref<8x64x128xf32, #tpu.memory_space<vmem>>, vector<1x64x128xf32>
    %109 = vector.shape_cast %108 : vector<1x64x128xf32> to vector<64x128xf32>
    %cst_101 = arith.constant dense<0.000000e+00> : vector<1x128xf32>
    %110 = tpu.matmul %107, %109, %cst_101 {dimension_numbers = #tpu.dot_dimension_numbers<[1], [0], [0], [1], [0, 0, 1, 1], [], []>} : vector<1x64xf32>, vector<64x128xf32>, vector<1x128xf32> -> vector<1x128xf32>
    %111 = arith.addf %106, %110 : vector<1x128xf32>
    %112 = vector.extract_strided_slice %100 {offsets = [2, 0], sizes = [1, 64], strides = [1, 1]} : vector<8x64xf32> to vector<1x64xf32>
    %c2_102 = arith.constant 2 : index
    %c0_103 = arith.constant 0 : index
    %c0_104 = arith.constant 0 : index
    %113 = vector.load %arg14[%c2_102, %c0_103, %c0_104] : memref<8x64x128xf32, #tpu.memory_space<vmem>>, vector<1x64x128xf32>
    %114 = vector.shape_cast %113 : vector<1x64x128xf32> to vector<64x128xf32>
    %cst_105 = arith.constant dense<0.000000e+00> : vector<1x128xf32>
    %115 = tpu.matmul %112, %114, %cst_105 {dimension_numbers = #tpu.dot_dimension_numbers<[1], [0], [0], [1], [0, 0, 1, 1], [], []>} : vector<1x64xf32>, vector<64x128xf32>, vector<1x128xf32> -> vector<1x128xf32>
    %116 = arith.addf %111, %115 : vector<1x128xf32>
    %117 = vector.extract_strided_slice %100 {offsets = [3, 0], sizes = [1, 64], strides = [1, 1]} : vector<8x64xf32> to vector<1x64xf32>
    %c3 = arith.constant 3 : index
    %c0_106 = arith.constant 0 : index
    %c0_107 = arith.constant 0 : index
    %118 = vector.load %arg14[%c3, %c0_106, %c0_107] : memref<8x64x128xf32, #tpu.memory_space<vmem>>, vector<1x64x128xf32>
    %119 = vector.shape_cast %118 : vector<1x64x128xf32> to vector<64x128xf32>
    %cst_108 = arith.constant dense<0.000000e+00> : vector<1x128xf32>
    %120 = tpu.matmul %117, %119, %cst_108 {dimension_numbers = #tpu.dot_dimension_numbers<[1], [0], [0], [1], [0, 0, 1, 1], [], []>} : vector<1x64xf32>, vector<64x128xf32>, vector<1x128xf32> -> vector<1x128xf32>
    %121 = arith.addf %116, %120 : vector<1x128xf32>
    %122 = vector.extract_strided_slice %100 {offsets = [4, 0], sizes = [1, 64], strides = [1, 1]} : vector<8x64xf32> to vector<1x64xf32>
    %c4 = arith.constant 4 : index
    %c0_109 = arith.constant 0 : index
    %c0_110 = arith.constant 0 : index
    %123 = vector.load %arg14[%c4, %c0_109, %c0_110] : memref<8x64x128xf32, #tpu.memory_space<vmem>>, vector<1x64x128xf32>
    %124 = vector.shape_cast %123 : vector<1x64x128xf32> to vector<64x128xf32>
    %cst_111 = arith.constant dense<0.000000e+00> : vector<1x128xf32>
    %125 = tpu.matmul %122, %124, %cst_111 {dimension_numbers = #tpu.dot_dimension_numbers<[1], [0], [0], [1], [0, 0, 1, 1], [], []>} : vector<1x64xf32>, vector<64x128xf32>, vector<1x128xf32> -> vector<1x128xf32>
    %126 = arith.addf %121, %125 : vector<1x128xf32>
    %127 = vector.extract_strided_slice %100 {offsets = [5, 0], sizes = [1, 64], strides = [1, 1]} : vector<8x64xf32> to vector<1x64xf32>
    %c5 = arith.constant 5 : index
    %c0_112 = arith.constant 0 : index
    %c0_113 = arith.constant 0 : index
    %128 = vector.load %arg14[%c5, %c0_112, %c0_113] : memref<8x64x128xf32, #tpu.memory_space<vmem>>, vector<1x64x128xf32>
    %129 = vector.shape_cast %128 : vector<1x64x128xf32> to vector<64x128xf32>
    %cst_114 = arith.constant dense<0.000000e+00> : vector<1x128xf32>
    %130 = tpu.matmul %127, %129, %cst_114 {dimension_numbers = #tpu.dot_dimension_numbers<[1], [0], [0], [1], [0, 0, 1, 1], [], []>} : vector<1x64xf32>, vector<64x128xf32>, vector<1x128xf32> -> vector<1x128xf32>
    %131 = arith.addf %126, %130 : vector<1x128xf32>
    %132 = vector.extract_strided_slice %100 {offsets = [6, 0], sizes = [1, 64], strides = [1, 1]} : vector<8x64xf32> to vector<1x64xf32>
    %c6 = arith.constant 6 : index
    %c0_115 = arith.constant 0 : index
    %c0_116 = arith.constant 0 : index
    %133 = vector.load %arg14[%c6, %c0_115, %c0_116] : memref<8x64x128xf32, #tpu.memory_space<vmem>>, vector<1x64x128xf32>
    %134 = vector.shape_cast %133 : vector<1x64x128xf32> to vector<64x128xf32>
    %cst_117 = arith.constant dense<0.000000e+00> : vector<1x128xf32>
    %135 = tpu.matmul %132, %134, %cst_117 {dimension_numbers = #tpu.dot_dimension_numbers<[1], [0], [0], [1], [0, 0, 1, 1], [], []>} : vector<1x64xf32>, vector<64x128xf32>, vector<1x128xf32> -> vector<1x128xf32>
    %136 = arith.addf %131, %135 : vector<1x128xf32>
    %137 = vector.extract_strided_slice %100 {offsets = [7, 0], sizes = [1, 64], strides = [1, 1]} : vector<8x64xf32> to vector<1x64xf32>
    %c7 = arith.constant 7 : index
    %c0_118 = arith.constant 0 : index
    %c0_119 = arith.constant 0 : index
    %138 = vector.load %arg14[%c7, %c0_118, %c0_119] : memref<8x64x128xf32, #tpu.memory_space<vmem>>, vector<1x64x128xf32>
    %139 = vector.shape_cast %138 : vector<1x64x128xf32> to vector<64x128xf32>
    %cst_120 = arith.constant dense<0.000000e+00> : vector<1x128xf32>
    %140 = tpu.matmul %137, %139, %cst_120 {dimension_numbers = #tpu.dot_dimension_numbers<[1], [0], [0], [1], [0, 0, 1, 1], [], []>} : vector<1x64xf32>, vector<64x128xf32>, vector<1x128xf32> -> vector<1x128xf32>
    %141 = arith.addf %136, %140 : vector<1x128xf32>
    %cst_121 = arith.constant 0.000000e+00 : f32
    %142 = vector.broadcast %cst_121 : f32 to vector<1x128xf32>
    %143 = arith.maximumf %141, %142 : vector<1x128xf32>
    %c0_122 = arith.constant 0 : index
    %c0_123 = arith.constant 0 : index
    %144 = vector.load %arg16[%c0_122, %c0_123] : memref<128x128xf32, #tpu.memory_space<vmem>>, vector<128x128xf32>
    %cst_124 = arith.constant dense<0.000000e+00> : vector<1x128xf32>
    %145 = tpu.matmul %143, %144, %cst_124 {dimension_numbers = #tpu.dot_dimension_numbers<[1], [0], [0], [1], [0, 0, 1, 1], [], []>} : vector<1x128xf32>, vector<128x128xf32>, vector<1x128xf32> -> vector<1x128xf32>
    %c0_125 = arith.constant 0 : index
    %c0_126 = arith.constant 0 : index
    %146 = vector.load %arg17[%c0_125, %c0_126] : memref<1x128xf32, #tpu.memory_space<vmem>>, vector<1x128xf32>
    %147 = arith.addf %145, %146 : vector<1x128xf32>
    %c0_127 = arith.constant 0 : index
    %c0_128 = arith.constant 0 : index
    %c0_129 = arith.constant 0 : index
    %148 = vector.load %arg18[%c0_127, %c0_128, %c0_129] : memref<1x1x128xf32, #tpu.memory_space<vmem>>, vector<1x1x128xf32>
    %149 = vector.shape_cast %148 : vector<1x1x128xf32> to vector<1x128xf32>
    %150 = vector.shape_cast %147 : vector<1x128xf32> to vector<1x1x128xf32>
    tpu.vector_store %arg18[%c0_127, %c0_128, %c0_129], %150 {strides = array<i32>} : memref<1x1x128xf32, #tpu.memory_space<vmem>>, vector<1x1x128xf32>,
    return
  }
  func.func @transform_0(%arg0: i32) -> (i32, i32, i32) {
    %c0_i32 = arith.constant 0 : i32
    %c0_i32_0 = arith.constant 0 : i32
    %c0_i32_1 = arith.constant 0 : i32
    return %arg0, %c0_i32, %c0_i32_0 : i32, i32, i32
  }
  func.func @transform_1(%arg0: i32) -> (i32, i32, i32) {
    %c0_i32 = arith.constant 0 : i32
    %c0_i32_0 = arith.constant 0 : i32
    %c0_i32_1 = arith.constant 0 : i32
    %c0_i32_2 = arith.constant 0 : i32
    return %c0_i32, %c0_i32_0, %c0_i32_1 : i32, i32, i32
  }
  func.func @transform_2(%arg0: i32) -> (i32, i32) {
    %c0_i32 = arith.constant 0 : i32
    %c0_i32_0 = arith.constant 0 : i32
    %c0_i32_1 = arith.constant 0 : i32
    return %c0_i32, %c0_i32_0 : i32, i32
  }
  func.func @transform_3(%arg0: i32) -> (i32, i32, i32) {
    %c0_i32 = arith.constant 0 : i32
    %c0_i32_0 = arith.constant 0 : i32
    %c0_i32_1 = arith.constant 0 : i32
    %c0_i32_2 = arith.constant 0 : i32
    return %c0_i32, %c0_i32_0, %c0_i32_1 : i32, i32, i32
  }
  func.func @transform_4(%arg0: i32) -> (i32, i32, i32) {
    %c0_i32 = arith.constant 0 : i32
    %c0_i32_0 = arith.constant 0 : i32
    %c0_i32_1 = arith.constant 0 : i32
    %c0_i32_2 = arith.constant 0 : i32
    return %c0_i32, %c0_i32_0, %c0_i32_1 : i32, i32, i32
  }
  func.func @transform_5(%arg0: i32) -> (i32, i32, i32) {
    %c0_i32 = arith.constant 0 : i32
    %c0_i32_0 = arith.constant 0 : i32
    %c0_i32_1 = arith.constant 0 : i32
    %c0_i32_2 = arith.constant 0 : i32
    return %c0_i32, %c0_i32_0, %c0_i32_1 : i32, i32, i32
  }
  func.func @transform_6(%arg0: i32) -> (i32, i32) {
    %c0_i32 = arith.constant 0 : i32
    %c0_i32_0 = arith.constant 0 : i32
    %c0_i32_1 = arith.constant 0 : i32
    return %c0_i32, %c0_i32_0 : i32, i32
  }
  func.func @transform_7(%arg0: i32) -> (i32, i32, i32) {
    %c0_i32 = arith.constant 0 : i32
    %c0_i32_0 = arith.constant 0 : i32
    %c0_i32_1 = arith.constant 0 : i32
    %c0_i32_2 = arith.constant 0 : i32
    return %c0_i32, %c0_i32_0, %c0_i32_1 : i32, i32, i32
  }
  func.func @transform_8(%arg0: i32) -> (i32, i32, i32) {
    %c0_i32 = arith.constant 0 : i32
    %c0_i32_0 = arith.constant 0 : i32
    %c0_i32_1 = arith.constant 0 : i32
    %c0_i32_2 = arith.constant 0 : i32
    return %c0_i32, %c0_i32_0, %c0_i32_1 : i32, i32, i32
  }
  func.func @transform_9(%arg0: i32) -> (i32, i32, i32) {
    %c0_i32 = arith.constant 0 : i32
    %c0_i32_0 = arith.constant 0 : i32
    %c0_i32_1 = arith.constant 0 : i32
    %c0_i32_2 = arith.constant 0 : i32
    return %c0_i32, %c0_i32_0, %c0_i32_1 : i32, i32, i32
  }
  func.func @transform_10(%arg0: i32) -> (i32, i32) {
    %c0_i32 = arith.constant 0 : i32
    %c0_i32_0 = arith.constant 0 : i32
    %c0_i32_1 = arith.constant 0 : i32
    return %c0_i32, %c0_i32_0 : i32, i32
  }
  func.func @transform_11(%arg0: i32) -> (i32, i32, i32) {
    %c0_i32 = arith.constant 0 : i32
    %c0_i32_0 = arith.constant 0 : i32
    %c0_i32_1 = arith.constant 0 : i32
    %c0_i32_2 = arith.constant 0 : i32
    return %c0_i32, %c0_i32_0, %c0_i32_1 : i32, i32, i32
  }
  func.func @transform_12(%arg0: i32) -> (i32, i32, i32) {
    %c0_i32 = arith.constant 0 : i32
    %c0_i32_0 = arith.constant 0 : i32
    %c0_i32_1 = arith.constant 0 : i32
    %c0_i32_2 = arith.constant 0 : i32
    return %c0_i32, %c0_i32_0, %c0_i32_1 : i32, i32, i32
  }
  func.func @transform_13(%arg0: i32) -> (i32, i32, i32) {
    %c0_i32 = arith.constant 0 : i32
    %c0_i32_0 = arith.constant 0 : i32
    %c0_i32_1 = arith.constant 0 : i32
    %c0_i32_2 = arith.constant 0 : i32
    return %c0_i32, %c0_i32_0, %c0_i32_1 : i32, i32, i32
  }
  func.func @transform_14(%arg0: i32) -> (i32, i32) {
    %c0_i32 = arith.constant 0 : i32
    %c0_i32_0 = arith.constant 0 : i32
    %c0_i32_1 = arith.constant 0 : i32
    return %c0_i32, %c0_i32_0 : i32, i32
  }
  func.func @transform_15(%arg0: i32) -> (i32, i32) {
    %c0_i32 = arith.constant 0 : i32
    %c0_i32_0 = arith.constant 0 : i32
    %c0_i32_1 = arith.constant 0 : i32
    return %c0_i32, %c0_i32_0 : i32, i32
  }
  func.func @transform_16(%arg0: i32) -> (i32, i32) {
    %c0_i32 = arith.constant 0 : i32
    %c0_i32_0 = arith.constant 0 : i32
    %c0_i32_1 = arith.constant 0 : i32
    return %c0_i32, %c0_i32_0 : i32, i32
  }
  func.func @transform_17(%arg0: i32) -> (i32, i32, i32) {
    %c0_i32 = arith.constant 0 : i32
    %c0_i32_0 = arith.constant 0 : i32
    %c0_i32_1 = arith.constant 0 : i32
    return %arg0, %c0_i32, %c0_i32_0 : i32, i32, i32
  }
}

</mosaic_0001>

<bundles_post_ra>
// kernel: cnn_forward.1
= control target key start
LH: loop header
LB: loop body
LE: loop exit
PB: predicated region body
PF: predicated region fallthrough
CT: control target
= control target key end

     0   :  { %s4850_s0 = inlined_call_operand.vmem [shape: f32[2,66,64], index: 0, kind: input, shape index: {}]   ;;  %s4851_s1 = inlined_call_operand.vmem [shape: f32[3,64,256], index: 1, kind: input, shape index: {}]   ;;  %s4852_s2 = inlined_call_operand.vmem [shape: f32[1,256], index: 2, kind: input, shape index: {}]   ;;  %s4853_s3 = inlined_call_operand.vmem [shape: f32[2,34,64], index: 3, kind: input, shape index: {}]   ;;  %s4854_s4 = inlined_call_operand.vmem [shape: f32[2,256,128], index: 4, kind: input, shape index: {}]   ;;  %s4855_s5 = inlined_call_operand.vmem [shape: f32[3,128,192], index: 5, kind: input, shape index: {}]   ;;  %s4856_s6 = inlined_call_operand.vmem [shape: f32[1,192], index: 6, kind: input, shape index: {}]   ;;  %s4857_s7 = inlined_call_operand.vmem [shape: f32[2,18,32], index: 7, kind: input, shape index: {}]   ;;  %s4858_s8 = inlined_call_operand.vmem [shape: f32[2,192,96], index: 8, kind: input, shape index: {}]   ;;  %s4859_s9 = inlined_call_operand.vmem [shape: f32[3,96,128], index: 9, kind: input, shape index: {}]   ;;  %s4860_s10 = inlined_call_operand.vmem [shape: f32[1,128], index: 10, kind: input, shape index: {}]   ;;  %s4861_s11 = inlined_call_operand.vmem [shape: f32[2,8,16], index: 11, kind: input, shape index: {}]   ;;  %s4862_s12 = inlined_call_operand.vmem [shape: f32[2,128,64], index: 12, kind: input, shape index: {}]   ;;  %s4863_s13 = inlined_call_operand.vmem [shape: f32[8,64,128], index: 13, kind: input, shape index: {}]   ;;  %s4864_s14 = inlined_call_operand.vmem [shape: f32[1,128], index: 14, kind: input, shape index: {}]   ;;  %s4865_s15 = inlined_call_operand.vmem [shape: f32[128,128], index: 15, kind: input, shape index: {}]   ;;  %s4866_s16 = inlined_call_operand.vmem [shape: f32[1,128], index: 16, kind: input, shape index: {}]   ;;  %s4867_s17 = inlined_call_operand.hbm [shape: f32[2,1,128], index: 17, kind: output, shape index: {}]  }
   0x1   :  { %4875 = sst [smem:[#allocation11_spill]] %s4850_s0 }
   0x2   :  { %4876 = sst [smem:[#allocation12_spill]] %s4851_s1 }
   0x3   :  { %4877 = sst [smem:[#allocation13_spill]] %s4852_s2 }
   0x4   :  { %4878 = sst [smem:[#allocation14_spill]] %s4866_s16 }
   0x5   :  { %22 = vsyncpa [#allocation3], 0 }
   0x6   :  { %24 = vsyncpa [#allocation3 + $0x1], 0  ;;  %s3234_s24 = smov 0   ;;  %s3236_s25 = smov 0  }
   0x7   :  { %s3238_s26 = smov 0   ;;  %s3240_s27 = smov 0  }
   0x8 LB: > { %4879 = sst [smem:[#allocation5_spill]] %s3130_s24  ;;  %s3255_s28 = sadd.s32 4294967295, %s3142_s27   ;;  %s3142_s27 = sphi %s3240_s27, %s4894_s27   ;;  %s3138_s26 = sphi %s3238_s26, %s4896_s26   ;;  %s3134_s25 = sphi %s3236_s25, %s4898_s25   ;;  %s3130_s24 = sphi %s3234_s24, %s4897_s24  }
   0x9   : > { %4880 = sst [smem:[#allocation6_spill]] %s3138_s26  ;;  %s2649_s29 = sadd.s32 4294967294, %s3142_s27  }
   0xa   : > { %4881 = sst [smem:[#allocation7_spill]] %s3142_s27  ;;  %s3259_s0 = sadd.s32 1, %s3142_s27  }
   0xb   : > { %4882 = sst [smem:[#allocation8_spill]] %s3259_s0  ;;  %s399_s30 = sadd.s32 1, %s3138_s26 }
   0xc   : > { %s396_s18 = ssub.s32 %s3142_s27, %s3259_s0  ;;  %p409_p0 = scmp.ne.s32.totalorder %s3138_s26, %s3134_s25 }
   0xd   : > { %p397_p1 = scmp.eq.s32.totalorder %s396_s18, 0  ;;  %p410_p2 = scmp.eq.s32.totalorder %s3255_s28, 1 }
   0xe   : > { %p415_p3 = scmp.ne.s32.totalorder %s3134_s25, %s3130_s24  ;;  %p416_p4 = scmp.eq.s32.totalorder %s2649_s29, 1 }
   0xf   : > { %s3270_s19 = scalar_select %p397_p1, %s3138_s26, %s399_s30  }
  0x10   : > { %p3272_p5 = por %p410_p2, %p409_p0  ;;  %p3276_p6 = por %p416_p4, %p415_p3 }
  0x11   : > { %4883 = sst [smem:[#allocation9_spill]] %s3270_s19  ;;  %p2652_p7 = scmp.ge.s32.totalorder %s3142_s27, 1 }
  0x12   : > { %s4885_s20 = scalar_select %p3276_p6, 1, 0 }
  0x13   : > { %p490_p8 = scmp.lt.s32.totalorder %s3142_s27, 3 }
  0x14   : > { %4886 = sst [smem:[#allocation10_spill]] %s4885_s20 }
  0x15   : > { %p491_p9 = pnand %p2652_p7, %p490_p8 }
  0x16   : > { %s4887_s23 = sld [smem:[#allocation12_spill]] (!%p491_p9)  ;;  %p541_p10 = scmp.lt.s32.totalorder (!%p491_p9), %s3255_s28, 1 }
  0x17   : > { %494 = sbr.rel (%p491_p9) target bundleno = 1835 (0x72b), region = 88  ;;  %s4888_s21 = sld [smem:[#allocation11_spill]] (!%p491_p9) }
  0x18   : > { %s4889_s2 = sld [smem:[#allocation13_spill]] (!%p491_p9)  ;;  %s2590_s16 = scalar_lea.hbm (!%p491_p9), %s4867_s17, %s3255_s28 }
  0x19   : > { %s4890_s0 = sld [smem:[#allocation14_spill]] (!%p491_p9)  ;;  %s3100_s18 = scalar_lea.hbm (!%p491_p9), %s4867_s17, 2 }
  0x1c   : > { %v2668_v0 = vld [vmem:[%s4887_s23 + $0xf0] sm:$0xff]  ;;  %v2669_v1 = vld [vmem:[%s4887_s23 + $0xf8] sm:$0xff]  ;;  %v2666_v3 = vld [vmem:[%s4887_s23 + $0xe0] sm:$0xff]  ;;  %s542_s27 = scalar_select %p541_p10, %s3255_s28, 1  ;;  %vm597_vm0 = vcmask 1046528   ;;  %vm615_vm1 = vcmask 523264  }
  0x1d   : > { %v570_v2 = vld [vmem:[%s4887_s23 + $0x78] sm:$0xff]  ;;  %640 = vmatpush.msra.mxu0 %v2668_v0  ;;  %681 = vmatpush.msra.mxu1 %v2669_v1  ;;  %v2667_v4 = vld [vmem:[%s4887_s23 + $0xe8] sm:$0xff]  ;;  %v2664_v6 = vld [vmem:[%s4887_s23 + $0xd0] sm:$0xff]  ;;  %vm829_vm2 = vcmask 1045504   ;;  %vm1712_vm3 = vcmask 261120   ;;  %vm2043_vm4 = vcmask 785408  }
  0x1e   : > { %v568_v5 = vld [vmem:[%s4887_s23 + $0x68] sm:$0xff]  ;;  %779 = vmatpush.msra.mxu3 %v570_v2  ;;  %v2665_v7 = vld [vmem:[%s4887_s23 + $0xd8] sm:$0xff]  ;;  %v2662_v9 = vld [vmem:[%s4887_s23 + $0xc0] sm:$0xff]  ;;  %s3039_s29 = smul.u32 72, %s542_s27  ;;  %vm2154_vm5 = vcmask 130048  }
  0x1f   : > { %641 = vmatpush.msra.mxu0 %v2666_v3  ;;  %682 = vmatpush.msra.mxu1 %v2667_v4  ;;  %v566_v8 = vld [vmem:[%s4887_s23 + $0x58] sm:$0xff]  ;;  %v2663_v10 = vld [vmem:[%s4887_s23 + $0xc8] sm:$0xff]  ;;  %v2660_v12 = vld [vmem:[%s4887_s23 + $0xb0] sm:$0xff] }
  0x20   : > { %780 = vmatpush.msra.mxu3 %v568_v5  ;;  %v564_v11 = vld [vmem:[%s4887_s23 + $0x48] sm:$0xff]  ;;  %v2661_v13 = vld [vmem:[%s4887_s23 + $0xb8] sm:$0xff]  ;;  %s3329_s22 = scalar_lea.vmem %s4888_s21, %s3039_s29  ;;  %v2658_v15 = vld [vmem:[%s4887_s23 + $0xa0] sm:$0xff]  ;;  %s2594_s21 = sshll.u32 %s2590_s16, 4  ;;  %s2595_s21 = int_to_ptr.hbm [resolvable:$true] %s2594_s21 }
  0x21   : > { %642 = vmatpush.msra.mxu0 %v2664_v6  ;;  %683 = vmatpush.msra.mxu1 %v2665_v7  ;;  %v562_v14 = vld [vmem:[%s4887_s23 + $0x38] sm:$0xff]  ;;  %v2659_v16 = vld [vmem:[%s4887_s23 + $0xa8] sm:$0xff]  ;;  %v3341_v17 = vld [vmem:[%s3329_s22] sm:$0xff]  ;;  %s3094_s30 = sshra.s32 %s2595_s21, 4  ;;  %s3095_s30 = int_to_ptr.hbm [resolvable:$true] %s3094_s30 }
  0x22   : > { %781 = vmatpush.msra.mxu3 %v566_v8  ;;  %v3344_v18 = vld [vmem:[%s3329_s22 + $0x8] sm:$0xff]  ;;  %v598_v20 = vrot.slane %v3341_v17, 1  ;;  %v569_v22 = vld [vmem:[%s4887_s23 + $0x70] sm:$0xff]  ;;  %v2657_v24 = vld [vmem:[%s4887_s23 + $0x98] sm:$0xff]  ;;  %p3101_p0 = scmp.lt.s32.totalorder %s3095_s30, %s4867_s17 }
  0x23   : > { %643 = vmatpush.msra.mxu0 %v2662_v9  ;;  %684 = vmatpush.msra.mxu1 %v2663_v10  ;;  %v560_v19 = vld [vmem:[%s4887_s23 + $0x28] sm:$0xff]  ;;  %v599_v21 = vrot.slane %v3344_v18, 1  ;;  %v2656_v23 = vld [vmem:[%s4887_s23 + $0x90] sm:$0xff]  ;;  %v567_v25 = vld [vmem:[%s4887_s23 + $0x60] sm:$0xff] }
  0x24   : > { %782 = vmatpush.msra.mxu3 %v564_v11  ;;  %3015 = vmatpush.msra.mxu2 %v569_v22  ;;  %v558_v26 = vld [vmem:[%s4887_s23 + $0x18] sm:$0xff]  ;;  %v565_v27 = vld [vmem:[%s4887_s23 + $0x50] sm:$0xff]  ;;  %v2654_v28 = vld [vmem:[%s4887_s23 + $0x80] sm:$0xff] }
  0x25   : > { %644 = vmatpush.msra.mxu0 %v2660_v12  ;;  %685 = vmatpush.msra.mxu1 %v2661_v13  ;;  %v2655_v29 = vld [vmem:[%s4887_s23 + $0x88] sm:$0xff]  ;;  %v600_v31 = vsel %vm597_vm0, %v598_v20, %v599_v21  ;;  %v3380_v32 = vld [vmem:[%s3329_s22 + $0x10] sm:$0xff]  ;;  %v563_v33 = vld [vmem:[%s4887_s23 + $0x40] sm:$0xff] }
  0x26   : > { %783 = vmatpush.msra.mxu3 %v562_v14  ;;  %3016 = vmatpush.msra.mxu2 %v567_v25  ;;  %v556_v30 = vld [vmem:[%s4887_s23 + $0x8] sm:$0xff]  ;;  %v601_v34 = vrot.slane %v3380_v32, 1  ;;  %v561_v35 = vld [vmem:[%s4887_s23 + $0x30] sm:$0xff]  ;;  %v559_v36 = vld [vmem:[%s4887_s23 + $0x20] sm:$0xff]  ;;  %v833_v2 = vrot.slane %v3380_v32, 2 }
  0x27   : > { %645 = vmatpush.msra.mxu0 %v2658_v15  ;;  %686 = vmatpush.msra.mxu1 %v2659_v16  ;;  %v557_v38 = vld [vmem:[%s4887_s23 + $0x10] sm:$0xff]  ;;  %v3401_v39 = vld [vmem:[%s3329_s22 + $0x18] sm:$0xff]  ;;  %v555_v40 = vld [vmem:[%s4887_s23] sm:$0xff]  ;;  %v830_v15 = vrot.slane %v3341_v17, 2  ;;  %v831_v16 = vrot.slane %v3344_v18, 2 }
  0x28   : > { %784 = vmatpush.msra.mxu3 %v560_v19  ;;  %3017 = vmatpush.msra.mxu2 %v565_v27  ;;  %v602_v37 = vsel %vm597_vm0, %v599_v21, %v601_v34  ;;  %v603_v41 = vrot.slane %v3401_v39, 1  ;;  %v3415_v43 = vld [vmem:[%s3329_s22 + $0x20] sm:$0xff]  ;;  %v2716_v45 = vld [vmem:[%s4887_s23 + $0x170] sm:$0xff]  ;;  %v3435_v49 = vld [vmem:[%s3329_s22 + $0x28] sm:$0xff]  ;;  %v835_v5 = vrot.slane %v3401_v39, 2 }
  0x29   : > { %646 = vmatpush.msra.mxu0 %v2656_v23  ;;  %687 = vmatpush.msra.mxu1 %v2657_v24  ;;  %v605_v44 = vrot.slane %v3415_v43, 1  ;;  %v2714_v46 = vld [vmem:[%s4887_s23 + $0x160] sm:$0xff]  ;;  %v2712_v47 = vld [vmem:[%s4887_s23 + $0x150] sm:$0xff]  ;;  %v607_v51 = vrot.slane %v3435_v49, 1  ;;  %v2717_v59 = vld [vmem:[%s4887_s23 + $0x178] sm:$0xff]  ;;  %v837_v12 = vrot.slane %v3415_v43, 2  ;;  %v832_v21 = vsel %vm829_vm2, %v830_v15, %v831_v16 }
  0x2a   : > { %785 = vmatpush.msra.mxu3 %v558_v26  ;;  %3018 = vmatpush.msra.mxu2 %v563_v33  ;;  %v604_v42 = vsel %vm597_vm0, %v601_v34, %v603_v41  ;;  %v2710_v50 = vld [vmem:[%s4887_s23 + $0x140] sm:$0xff]  ;;  %v2708_v52 = vld [vmem:[%s4887_s23 + $0x130] sm:$0xff]  ;;  %v2715_v60 = vld [vmem:[%s4887_s23 + $0x168] sm:$0xff]  ;;  %v836_v7 = vsel %vm829_vm2, %v833_v2, %v835_v5  ;;  %v839_v19 = vrot.slane %v3435_v49, 2  ;;  %v834_v24 = vsel %vm829_vm2, %v831_v16, %v833_v2 }
  0x2b   : > { %647 = vmatpush.msra.mxu0 %v2654_v28  ;;  %688 = vmatpush.msra.mxu1 %v2655_v29  ;;  %v606_v48 = vsel %vm597_vm0, %v603_v41, %v605_v44  ;;  %v2706_v53 = vld [vmem:[%s4887_s23 + $0x120] sm:$0xff]  ;;  %v608_v54 = vsel %vm597_vm0, %v605_v44, %v607_v51  ;;  %v3455_v55 = vld [vmem:[%s3329_s22 + $0x30] sm:$0xff]  ;;  %v2713_v61 = vld [vmem:[%s4887_s23 + $0x158] sm:$0xff]  ;;  %v838_v13 = vsel %vm829_vm2, %v835_v5, %v837_v12 }
  0x2c   : > { %786 = vmatpush.msra.mxu3 %v556_v30  ;;  %2670 = vmatmul.msk.f32.vlgmr.msra.gmra.mxu0 %vm615_vm1, %v600_v31  ;;  %v2704_v56 = vld [vmem:[%s4887_s23 + $0x110] sm:$0xff]  ;;  %v609_v57 = vrot.slane %v3455_v55, 1  ;;  %v2702_v58 = vld [vmem:[%s4887_s23 + $0x100] sm:$0xff]  ;;  %v2711_v63 = vld [vmem:[%s4887_s23 + $0x148] sm:$0xff]  ;;  %v840_v20 = vsel %vm829_vm2, %v837_v12, %v839_v19 }
  0x2d   : > { %2678 = vmatmul.msk.f32.vlgmr.msra.gmra.mxu1 %vm615_vm1, %v600_v31  ;;  %2694 = vmatmul.msk.f32.vlgmr.msra.gmra.mxu3 %vm615_vm1, %v3341_v17  ;;  %v553_v0 = vld [vmem:[%s3329_s22 + $0x38] sm:$0xff]  ;;  %v2707_v4 = vld [vmem:[%s4887_s23 + $0x128] sm:$0xff]  ;;  %v554_v10 = vld [vmem:[%s3329_s22 + $0x40] sm:$0x3]  ;;  %s539_s22 = sand.u32 1, %s3134_s25  }
  0x2e   : > { %738 = vmatpush.msrb.mxu1 %v569_v22  ;;  %3019 = vmatpush.msra.mxu2 %v561_v35  ;;  %v610_v62 = vsel %vm597_vm0, %v607_v51, %v609_v57  ;;  %v611_v1 = vrot.slane %v553_v0, 1  ;;  %v2709_v3 = vld [vmem:[%s4887_s23 + $0x138] sm:$0xff]  ;;  %v2703_v9 = vld [vmem:[%s4887_s23 + $0x108] sm:$0xff]  ;;  %v613_v11 = vrot.slane %v554_v10, 1  ;;  %v841_v22 = vrot.slane %v3455_v55, 2  ;;  %s540_s20 = scalar_lea.vmem [#allocation2], %s539_s22 }
  0x2f   : > { %871 = vmatpush.msrb.mxu0 %v2716_v45  ;;  %v2705_v6 = vld [vmem:[%s4887_s23 + $0x118] sm:$0xff]  ;;  %s2592_s24 = sshll.u32 %s540_s20, 4  ;;  %s2582_s27 = scalar_lea.sflag [#allocation3], %s539_s22  ;;  %s2593_s24 = int_to_ptr.vmem [resolvable:$true] %s2592_s24 }
  0x30   : > { %739 = vmatpush.msrb.mxu1 %v567_v25  ;;  %3020 = vmatpush.msra.mxu2 %v559_v36  ;;  %v612_v8 = vsel %vm597_vm0, %v609_v57, %v611_v1  ;;  %v614_v14 = vsel %vm597_vm0, %v611_v1, %v613_v11  ;;  %v842_v23 = vsel %vm829_vm2, %v839_v19, %v841_v22  ;;  %v843_v25 = vrot.slane %v553_v0, 2 }
  0x31   : > { %872 = vmatpush.msrb.mxu0 %v2714_v46 }
  0x32   : > { %740 = vmatpush.msrb.mxu1 %v565_v27  ;;  %3021 = vmatpush.msra.mxu2 %v557_v38  ;;  %v844_v26 = vsel %vm829_vm2, %v841_v22, %v843_v25  ;;  %v845_v27 = vrot.slane %v554_v10, 2 }
  0x33   : > { %873 = vmatpush.msrb.mxu0 %v2712_v47 }
  0x34   : > { %2671 = vmatmul.msk.f32.gmra.mxu0 %vm615_vm1, %v602_v37  ;;  %3022 = vmatpush.msra.mxu2 %v555_v40 }
  0x35   : > { %2679 = vmatmul.msk.f32.gmra.mxu1 %vm615_vm1, %v602_v37  ;;  %2695 = vmatmul.msk.f32.gmra.mxu3 %vm615_vm1, %v3344_v18 }
  0x36   : > { %741 = vmatpush.msrb.mxu1 %v563_v33  ;;  %2688 = vmatmul.msk.f32.vlgmr.msra.gmra.mxu2 %vm615_vm1, %v3380_v32 }
  0x37   : > { %874 = vmatpush.msrb.mxu0 %v2710_v50 }
  0x38   : > { %742 = vmatpush.msrb.mxu1 %v561_v35 }
  0x39   : > { %875 = vmatpush.msrb.mxu0 %v2708_v52 }
  0x3a   : > { %743 = vmatpush.msrb.mxu1 %v559_v36 }
  0x3b   : > { %876 = vmatpush.msrb.mxu0 %v2706_v53 }
  0x3c   : > { %2672 = vmatmul.msk.f32.gmra.mxu0 %vm615_vm1, %v604_v42  ;;  %744 = vmatpush.msrb.mxu1 %v557_v38 }
  0x3d   : > { %2680 = vmatmul.msk.f32.gmra.mxu1 %vm615_vm1, %v604_v42  ;;  %2696 = vmatmul.msk.f32.gmra.mxu3 %vm615_vm1, %v3380_v32 }
  0x3e   : > { %745 = vmatpush.msrb.mxu1 %v555_v40  ;;  %2689 = vmatmul.msk.f32.gmra.mxu2 %vm615_vm1, %v3401_v39 }
  0x3f   : > { %877 = vmatpush.msrb.mxu0 %v2704_v56 }
  0x40   : > { %912 = vmatpush.msra.mxu1 %v2717_v59 }
  0x41   : > { %878 = vmatpush.msrb.mxu0 %v2702_v58 }
  0x42   : > { %913 = vmatpush.msra.mxu1 %v2715_v60 }
  0x44   : > { %2673 = vmatmul.msk.f32.gmra.mxu0 %vm615_vm1, %v606_v48  ;;  %914 = vmatpush.msra.mxu1 %v2713_v61 }
  0x45   : > { %2681 = vmatmul.msk.f32.gmra.mxu1 %vm615_vm1, %v606_v48  ;;  %2697 = vmatmul.msk.f32.gmra.mxu3 %vm615_vm1, %v3401_v39 }
  0x46   : > { %2690 = vmatmul.msk.f32.gmra.mxu2 %vm615_vm1, %v3415_v43  ;;  %915 = vmatpush.msra.mxu1 %v2711_v63 }
  0x48   : > { %916 = vmatpush.msra.mxu1 %v2709_v3 }
  0x4a   : > { %917 = vmatpush.msra.mxu1 %v2707_v4 }
  0x4c   : > { %2674 = vmatmul.msk.f32.gmra.mxu0 %vm615_vm1, %v608_v54  ;;  %918 = vmatpush.msra.mxu1 %v2705_v6  ;;  %v961_v6 = vld [vmem:[%s4889_s2] sm:$0x3]  ;;  %s3096_s2 = scalar_lea.hbm %s3095_s30, 1 }
  0x4d   : > { %2682 = vmatmul.msk.f32.gmra.mxu1 %vm615_vm1, %v608_v54  ;;  %2698 = vmatmul.msk.f32.gmra.mxu3 %vm615_vm1, %v3415_v43  ;;  %v963_v15 = vperm.slane %v961_v6, 0  ;;  %p3097_p11 = scmp.ne.s32.totalorder %s3095_s30, %s3096_s2  ;;  %p3102_p1 = scmp.lt.s32.totalorder %s3100_s18, %s3096_s2 }
  0x4e   : > { %2691 = vmatmul.msk.f32.gmra.mxu2 %vm615_vm1, %v3435_v49  ;;  %919 = vmatpush.msra.mxu1 %v2703_v9 }
  0x4f   : > { %p3098_p12 = pnand %p3097_p11, %p3272_p5  ;;  %p3103_p2 = por %p3102_p1, %p3101_p0 }
  0x51   : > { %p3099_p13 = pneg %p3098_p12 }
  0x53   : > { %p3104_p3 = pnand %p3103_p2, %p3099_p13 }
  0x54   : > { %2675 = vmatmul.msk.f32.gmra.mxu0 %vm615_vm1, %v610_v62 }
  0x55   : > { %2683 = vmatmul.msk.f32.gmra.mxu1 %vm615_vm1, %v610_v62  ;;  %2699 = vmatmul.msk.f32.gmra.mxu3 %vm615_vm1, %v3435_v49 }
  0x56   : > { %2692 = vmatmul.msk.f32.gmra.mxu2 %vm615_vm1, %v3455_v55 }
  0x5c   : > { %2676 = vmatmul.msk.f32.gmra.mxu0 %vm615_vm1, %v612_v8 }
  0x5d   : > { %2684 = vmatmul.msk.f32.gmra.mxu1 %vm615_vm1, %v612_v8  ;;  %2700 = vmatmul.msk.f32.gmra.mxu3 %vm615_vm1, %v3455_v55 }
  0x5e   : > { %2693 = vmatmul.msk.f32.gmra.mxu2 %vm615_vm1, %v553_v0 }
  0x64   : > { %2677 = vmatmul.msk.f32.gmra.mxu0 %vm615_vm1, %v614_v14 }
  0x65   : > { %2685 = vmatmul.msk.f32.gmra.mxu1 %vm615_vm1, %v614_v14  ;;  %2701 = vmatmul.msk.f32.gmra.mxu3 %vm615_vm1, %v553_v0 }
  0x6c   : > { %2718 = vmatmul.msk.f32.vlgmr.msrb.gmra.mxu0 %vm615_vm1, %v832_v21 }
  0x6d   : > { %2686 = vmatmul.msk.f32.vlgmr.msrb.gmra.mxu1 %vm615_vm1, %v3341_v17  ;;  %v846_v17 = vsel %vm829_vm2, %v843_v25, %v845_v27 }
  0x74   : > { %2719 = vmatmul.msk.f32.gmra.mxu0 %vm615_vm1, %v834_v24 }
  0x75   : > { %2687 = vmatmul.msk.f32.gmra.mxu1 %vm615_vm1, %v3344_v18 }
  0x7c   : > { %2720 = vmatmul.msk.f32.gmra.mxu0 %vm615_vm1, %v836_v7 }
  0x7d   : > { %2726 = vmatmul.msk.f32.vlgmr.msra.gmra.mxu1 %vm615_vm1, %v832_v21 }
  0x84   : > { %2721 = vmatmul.msk.f32.gmra.mxu0 %vm615_vm1, %v838_v13 }
  0x85   : > { %2727 = vmatmul.msk.f32.gmra.mxu1 %vm615_vm1, %v834_v24 }
  0x8c   : > { %2722 = vmatmul.msk.f32.gmra.mxu0 %vm615_vm1, %v840_v20 }
  0x8d   : > { %2728 = vmatmul.msk.f32.gmra.mxu1 %vm615_vm1, %v836_v7 }
  0x94   : > { %2723 = vmatmul.msk.f32.gmra.mxu0 %vm615_vm1, %v842_v23 }
  0x95   : > { %2729 = vmatmul.msk.f32.gmra.mxu1 %vm615_vm1, %v838_v13 }
  0x9c   : > { %2724 = vmatmul.msk.f32.gmra.mxu0 %vm615_vm1, %v844_v26 }
  0x9d   : > { %2730 = vmatmul.msk.f32.gmra.mxu1 %vm615_vm1, %v840_v20 }
  0xa4   : > { %2725 = vmatmul.msk.f32.gmra.mxu0 %vm615_vm1, %v846_v17 }
  0xa5   : > { %2731 = vmatmul.msk.f32.gmra.mxu1 %vm615_vm1, %v842_v23 }
  0xa9   : > { %v3546_v18 = vpop.f32.mrf.mxu0 }
  0xaa   : > { %v3548_v28 = vpop.f32.mrf.mxu1 }
  0xad   : > { %2732 = vmatmul.msk.f32.gmra.mxu1 %vm615_vm1, %v844_v26 }
  0xb0   : > { %v3566_v43 = vpop.f32.mrf.mxu3 }
  0xb1   : > { %v652_v29 = vpop.f32.mrf.mxu0 }
  0xb2   : > { %v3551_v30 = vpop.f32.mrf.mxu1 }
  0xb5   : > { %2733 = vmatmul.msk.f32.gmra.mxu1 %vm615_vm1, %v846_v17 }
  0xb8   : > { %v3568_v48 = vpop.f32.mrf.mxu3 }
  0xb9   : > { %v655_v31 = vpop.f32.mrf.mxu0  ;;  %v753_v46 = vpop.f32.mrf.mxu2 }
  0xba   : > { %v3554_v32 = vpop.f32.mrf.mxu1  ;;  %v754_v23 = vadd.f32 %v753_v46, %v655_v31 }
  0xc0   : > { %v3572_v53 = vpop.f32.mrf.mxu3 }
  0xc1   : > { %v658_v33 = vpop.f32.mrf.mxu0  ;;  %v756_v50 = vpop.f32.mrf.mxu2 }
  0xc2   : > { %v3556_v34 = vpop.f32.mrf.mxu1  ;;  %v757_v19 = vadd.f32 %v756_v50, %v658_v33 }
  0xc8   : > { %v3576_v57 = vpop.f32.mrf.mxu3 }
  0xc9   : > { %v661_v35 = vpop.f32.mrf.mxu0  ;;  %v759_v54 = vpop.f32.mrf.mxu2 }
  0xca   : > { %v3558_v36 = vpop.f32.mrf.mxu1  ;;  %v760_v11 = vadd.f32 %v759_v54, %v661_v35 }
  0xd0   : > { %v800_v61 = vpop.f32.mrf.mxu3 }
  0xd1   : > { %v664_v37 = vpop.f32.mrf.mxu0  ;;  %v762_v58 = vpop.f32.mrf.mxu2 }
  0xd2   : > { %v3560_v38 = vpop.f32.mrf.mxu1  ;;  %v763_v7 = vadd.f32 %v762_v58, %v664_v37 }
  0xd8   : > { %v803_v2 = vpop.f32.mrf.mxu3 }
  0xd9   : > { %v667_v39 = vpop.f32.mrf.mxu0  ;;  %v765_v0 = vpop.f32.mrf.mxu2 }
  0xda   : > { %v3562_v40 = vpop.f32.mrf.mxu1  ;;  %v766_v5 = vadd.f32 %v765_v0, %v667_v39 }
  0xe0   : > { %v806_v16 = vpop.f32.mrf.mxu3 }
  0xe1   : > { %v670_v41 = vpop.f32.mrf.mxu0  ;;  %v768_v4 = vpop.f32.mrf.mxu2 }
  0xe2   : > { %v3564_v42 = vpop.f32.mrf.mxu1  ;;  %v769_v8 = vadd.f32 %v768_v4, %v670_v41 }
  0xe8   : > { %v809_v31 = vpop.f32.mrf.mxu3 }
  0xe9   : > { %v880_v44 = vpop.f32.mrf.mxu0 }
  0xea   : > { %v747_v45 = vpop.f32.mrf.mxu1 }
  0xeb   : > { %v748_v17 = vadd.f32 %v747_v45, %v3546_v18 }
  0xed   : > { %v945_v33 = vadd.f32 %v880_v44, %v748_v17  ;;  %v1192_v17 = vld [vmem:[%s4854_s4 + $0x70] sm:$0xff] }
  0xef   : > { %v967_v45 = vadd.f32 %v963_v15, %v945_v33  ;;  %v1188_v33 = vld [vmem:[%s4854_s4 + $0x50] sm:$0xff] }
  0xf1   : > { %v883_v47 = vpop.f32.mrf.mxu0 }
  0xf2   : > { %v750_v49 = vpop.f32.mrf.mxu1 }
  0xf3   : > { %v751_v24 = vadd.f32 %v750_v49, %v652_v29  ;;  %v807_v49 = vadd.f32 %v806_v16, %v3562_v40  ;;  %v999_v40 = vld [vmem:[%s4853_s3] sm:$0xff] }
  0xf5   : > { %v947_v41 = vadd.f32 %v883_v47, %v751_v24  ;;  %v810_v47 = vadd.f32 %v809_v31, %v3564_v42  ;;  %v2747_v24 = vld [vmem:[%s4853_s3 + $0x40] sm:$0xff]  ;;  %v2768_v31 = vld [vmem:[%s4854_s4 + $0x148] sm:$0xff] }
  0xf7   : > { %v969_v46 = vadd.f32 %v963_v15, %v947_v41  ;;  %v1190_v41 = vld [vmem:[%s4854_s4 + $0x60] sm:$0xff] }
  0xf9   : > { %v886_v51 = vpop.f32.mrf.mxu0  ;;  %v985_v44 = vmax.f32 %v969_v46, 0.0  ;;  %v2767_v46 = vld [vmem:[%s4854_s4 + $0x140] sm:$0xff] }
  0xfa   : > { %v3570_v52 = vpop.f32.mrf.mxu1  ;;  %v949_v37 = vadd.f32 %v886_v51, %v754_v23  ;;  %v804_v51 = vadd.f32 %v803_v2, %v3560_v38  ;;  %v798_v38 = vadd.f32 %v3576_v57, %v3556_v34  ;;  %v2746_v23 = vld [vmem:[%s4853_s3 + $0x38] sm:$0xff] }
 0x101   : > { %v889_v55 = vpop.f32.mrf.mxu0 }
 0x102   : > { %v3574_v56 = vpop.f32.mrf.mxu1  ;;  %v951_v25 = vadd.f32 %v889_v55, %v757_v19  ;;  %v1002_v19 = vld [vmem:[%s4853_s3 + $0x18] sm:$0xff] }
 0x109   : > { %v892_v59 = vpop.f32.mrf.mxu0 }
 0x10a   : > { %v3578_v60 = vpop.f32.mrf.mxu1  ;;  %v953_v20 = vadd.f32 %v892_v59, %v760_v11  ;;  %v971_v59 = vadd.f32 %v963_v15, %v949_v37  ;;  %v792_v11 = vadd.f32 %v3568_v48, %v3551_v30  ;;  %v2773_v37 = vld [vmem:[%s4854_s4 + $0x170] sm:$0xff] }
 0x10c   : > { %v975_v35 = vadd.f32 %v963_v15, %v953_v20  ;;  %v987_v18 = vmax.f32 %v971_v59, 0.0  ;;  %v1003_v20 = vld [vmem:[%s4853_s3 + $0x20] sm:$0x3]  ;;  %v1187_v59 = vld [vmem:[%s4854_s4 + $0x48] sm:$0xff] }
 0x10e   : > { %v991_v50 = vmax.f32 %v975_v35, 0.0  ;;  %v2772_v35 = vld [vmem:[%s4854_s4 + $0x168] sm:$0xff] }
 0x111   : > { %v895_v62 = vpop.f32.mrf.mxu0 }
 0x112   : > { %v3580_v63 = vpop.f32.mrf.mxu1  ;;  %v955_v12 = vadd.f32 %v895_v62, %v763_v7  ;;  %v973_v62 = vadd.f32 %v963_v15, %v951_v25  ;;  %v964_v7 = vperm.slane %v961_v6, 1  ;;  %v2748_v25 = vld [vmem:[%s4853_s3 + $0x48] sm:$0x3] }
 0x114   : > { %v977_v27 = vadd.f32 %v963_v15, %v955_v12  ;;  %v989_v29 = vmax.f32 %v973_v62, 0.0  ;;  %v2770_v62 = vld [vmem:[%s4854_s4 + $0x158] sm:$0xff] }
 0x116   : > { %v993_v58 = vmax.f32 %v977_v27, 0.0  ;;  %v2774_v27 = vld [vmem:[%s4854_s4 + $0x178] sm:$0xff] }
 0x119   : > { %v898_v1 = vpop.f32.mrf.mxu0 }
 0x11a   : > { %v933_v3 = vpop.f32.mrf.mxu1  ;;  %v957_v9 = vadd.f32 %v898_v1, %v766_v5  ;;  %v801_v1 = vadd.f32 %v800_v61, %v3558_v36  ;;  %v952_v36 = vadd.f32 %v3580_v63, %v798_v38  ;;  %v1206_v38 = vld [vmem:[%s4854_s4 + $0xe0] sm:$0xff] }
 0x11c   : > { %v979_v22 = vadd.f32 %v963_v15, %v957_v9  ;;  %v954_v2 = vadd.f32 %v933_v3, %v801_v1  ;;  %v789_v3 = vadd.f32 %v3566_v43, %v3548_v28  ;;  %v974_v63 = vadd.f32 %v964_v7, %v952_v36  ;;  %v2762_v36 = vld [vmem:[%s4854_s4 + $0x118] sm:$0xff] }
 0x11e   : > { %v995_v39 = vmax.f32 %v979_v22, 0.0  ;;  %v976_v57 = vadd.f32 %v964_v7, %v954_v2  ;;  %v946_v30 = vadd.f32 %v3570_v52, %v789_v3  ;;  %v990_v28 = vmax.f32 %v974_v63, 0.0  ;;  %v1001_v52 = vld [vmem:[%s4853_s3 + $0x10] sm:$0xff]  ;;  %v2763_v2 = vld [vmem:[%s4854_s4 + $0x120] sm:$0xff]  ;;  %v1179_v3 = vld [vmem:[%s4854_s4 + $0x8] sm:$0xff] }
 0x11f   : > { %v2745_v22 = vld [vmem:[%s4853_s3 + $0x30] sm:$0xff]  ;;  %v2784_v63 = vld [vmem:[%s4854_s4 + $0x1c8] sm:$0xff] }
 0x120   : > { %v992_v48 = vmax.f32 %v976_v57, 0.0 }
 0x121   : > { %v901_v10 = vpop.f32.mrf.mxu0 }
 0x122   : > { %v959_v13 = vadd.f32 %v901_v10, %v769_v8  ;;  %v936_v14 = vpop.f32.mrf.mxu1  ;;  %v983_v8 = vmax.f32 %v967_v45, 0.0  ;;  %v795_v10 = vadd.f32 %v3572_v53, %v3554_v32  ;;  %v948_v32 = vadd.f32 %v3574_v56, %v792_v11  ;;  %v2766_v45 = vld [vmem:[%s4854_s4 + $0x138] sm:$0xff]  ;;  %v1204_v11 = vld [vmem:[%s4854_s4 + $0xd0] sm:$0xff] }
 0x123   : > { %v956_v4 = vadd.f32 %v936_v14, %v804_v51  ;;  %v968_v14 = vadd.f32 %v964_v7, %v946_v30  ;;  %v2790_v51 = vld [vmem:[%s4854_s4 + $0x1f8] sm:$0xff]  ;;  %v1202_v30 = vld [vmem:[%s4854_s4 + $0xc0] sm:$0xff] }
 0x124   : > { %v981_v21 = vadd.f32 %v963_v15, %v959_v13  ;;  %v950_v12 = vadd.f32 %v3578_v60, %v795_v10  ;;  %v1000_v13 = vld [vmem:[%s4853_s3 + $0x8] sm:$0xff]  ;;  %v970_v43 = vadd.f32 %v964_v7, %v948_v32  ;;  %v1205_v10 = vld [vmem:[%s4854_s4 + $0xd8] sm:$0xff] }
 0x125   : > { %v978_v6 = vadd.f32 %v964_v7, %v956_v4  ;;  %v984_v16 = vmax.f32 %v968_v14, 0.0  ;;  %v1183_v4 = vld [vmem:[%s4854_s4 + $0x28] sm:$0xff]  ;;  %v2781_v14 = vld [vmem:[%s4854_s4 + $0x1b0] sm:$0xff] }
 0x126   : > { %v997_v26 = vmax.f32 %v981_v21, 0.0  ;;  %v972_v60 = vadd.f32 %v964_v7, %v950_v12  ;;  %v986_v15 = vmax.f32 %v970_v43, 0.0  ;;  %v2744_v21 = vld [vmem:[%s4853_s3 + $0x28] sm:$0xff]  ;;  %v2761_v12 = vld [vmem:[%s4854_s4 + $0x110] sm:$0xff]  ;;  %v2782_v43 = vld [vmem:[%s4854_s4 + $0x1b8] sm:$0xff] }
 0x127   : > { %v994_v53 = vmax.f32 %v978_v6, 0.0  ;;  %v1180_v6 = vld [vmem:[%s4854_s4 + $0x10] sm:$0xff]  ;;  %v1203_v32 = vld [vmem:[%s4854_s4 + $0xc8] sm:$0xff] }
 0x128   : > { %1027 = vmatpush.msrb.mxu2 %v997_v26  ;;  %v988_v56 = vmax.f32 %v972_v60, 0.0  ;;  %v2783_v60 = vld [vmem:[%s4854_s4 + $0x1c0] sm:$0xff] }
 0x12a   : > { %v939_v54 = vpop.f32.mrf.mxu1  ;;  %1028 = vmatpush.msrb.mxu2 %v995_v39 }
 0x12b   : > { %v958_v55 = vadd.f32 %v939_v54, %v807_v49  ;;  %v2771_v54 = vld [vmem:[%s4854_s4 + $0x160] sm:$0xff]  ;;  %v1209_v49 = vld [vmem:[%s4854_s4 + $0xf8] sm:$0xff] }
 0x12c   : > { %1029 = vmatpush.msrb.mxu2 %v993_v58  ;;  %1242 = vmatpush.msrb.mxu1 %v1209_v49 }
 0x12d   : > { %v980_v9 = vadd.f32 %v964_v7, %v958_v55  ;;  %v2789_v55 = vld [vmem:[%s4854_s4 + $0x1f0] sm:$0xff] }
 0x12e   : > { %1030 = vmatpush.msrb.mxu2 %v991_v50 }
 0x12f   : > { %v996_v34 = vmax.f32 %v980_v9, 0.0  ;;  %v1181_v9 = vld [vmem:[%s4854_s4 + $0x18] sm:$0xff] }
 0x130   : > { %1031 = vmatpush.msrb.mxu2 %v989_v29 }
 0x132   : > { %v942_v0 = vpop.f32.mrf.mxu1  ;;  %1032 = vmatpush.msrb.mxu2 %v987_v18 }
 0x133   : > { %v960_v5 = vadd.f32 %v942_v0, %v810_v47  ;;  %v1208_v47 = vld [vmem:[%s4854_s4 + $0xf0] sm:$0xff] }
 0x134   : > { %1033 = vmatpush.msrb.mxu2 %v985_v44  ;;  %v1184_v0 = vld [vmem:[%s4854_s4 + $0x30] sm:$0xff]  ;;  %1243 = vmatpush.msrb.mxu1 %v1208_v47  ;;  %v1404_v47 = vld [vmem:[%s4855_s5 + $0xe0] sm:$0xff] }
 0x135   : > { %v982_v42 = vadd.f32 %v964_v7, %v960_v5  ;;  %v1207_v5 = vld [vmem:[%s4854_s4 + $0xe8] sm:$0xff] }
 0x136   : > { %1034 = vmatpush.msrb.mxu2 %v983_v8  ;;  %v2764_v7 = vld [vmem:[%s4854_s4 + $0x128] sm:$0xff]  ;;  %1244 = vmatpush.msrb.mxu1 %v1207_v5 }
 0x137   : > { %2734 = vmatmul.msk.f32.vlgmr.msrb.gmra.mxu2 %vm615_vm1, %v999_v40  ;;  %v998_v61 = vmax.f32 %v982_v42, 0.0  ;;  %v2787_v42 = vld [vmem:[%s4854_s4 + $0x1e0] sm:$0xff] }
 0x138   : > { %1112 = vmatpush.msra.mxu2 %v997_v26  ;;  %v1193_v26 = vld [vmem:[%s4854_s4 + $0x78] sm:$0xff]  ;;  %1245 = vmatpush.msrb.mxu1 %v1206_v38 }
 0x139   : > { %1059 = vmatpush.msrb.mxu3 %v998_v61  ;;  %1210 = vmatpush.msra.mxu0 %v1193_v26 }
 0x13a   : > { %1113 = vmatpush.msra.mxu2 %v995_v39  ;;  %v1191_v39 = vld [vmem:[%s4854_s4 + $0x68] sm:$0xff]  ;;  %1246 = vmatpush.msrb.mxu1 %v1205_v10  ;;  %v1402_v10 = vld [vmem:[%s4855_s5 + $0xd0] sm:$0xff] }
 0x13b   : > { %1060 = vmatpush.msrb.mxu3 %v996_v34  ;;  %1211 = vmatpush.msra.mxu0 %v1192_v17  ;;  %v1195_v17 = vld [vmem:[%s4854_s4 + $0x88] sm:$0xff] }
 0x13c   : > { %1114 = vmatpush.msra.mxu2 %v993_v58  ;;  %v1189_v58 = vld [vmem:[%s4854_s4 + $0x58] sm:$0xff]  ;;  %1247 = vmatpush.msrb.mxu1 %v1204_v11  ;;  %v1398_v11 = vld [vmem:[%s4855_s5 + $0xb0] sm:$0xff] }
 0x13d   : > { %1061 = vmatpush.msrb.mxu3 %v994_v53  ;;  %1212 = vmatpush.msra.mxu0 %v1191_v39  ;;  %v1194_v39 = vld [vmem:[%s4854_s4 + $0x80] sm:$0xff] }
 0x13e   : > { %1115 = vmatpush.msra.mxu2 %v991_v50  ;;  %v2769_v50 = vld [vmem:[%s4854_s4 + $0x150] sm:$0xff]  ;;  %1248 = vmatpush.msrb.mxu1 %v1203_v32  ;;  %v2822_v32 = vld [vmem:[%s4855_s5 + $0x1f8] sm:$0xff] }
 0x13f   : > { %1062 = vmatpush.msrb.mxu3 %v992_v48  ;;  %2735 = vmatmul.msk.f32.gmra.mxu2 %vm615_vm1, %v1000_v13 }
 0x140   : > { %1116 = vmatpush.msra.mxu2 %v989_v29  ;;  %1213 = vmatpush.msra.mxu0 %v1190_v41  ;;  %v1186_v29 = vld [vmem:[%s4854_s4 + $0x40] sm:$0xff] }
 0x141   : > { %1063 = vmatpush.msrb.mxu3 %v990_v28  ;;  %1249 = vmatpush.msrb.mxu1 %v1202_v30  ;;  %v2820_v30 = vld [vmem:[%s4855_s5 + $0x1e8] sm:$0xff] }
 0x142   : > { %1117 = vmatpush.msra.mxu2 %v987_v18  ;;  %1214 = vmatpush.msra.mxu0 %v1189_v58  ;;  %v1185_v18 = vld [vmem:[%s4854_s4 + $0x38] sm:$0xff] }
 0x143   : > { %1064 = vmatpush.msrb.mxu3 %v988_v56 }
 0x144   : > { %1118 = vmatpush.msra.mxu2 %v985_v44  ;;  %1215 = vmatpush.msra.mxu0 %v1188_v33  ;;  %v2765_v44 = vld [vmem:[%s4854_s4 + $0x130] sm:$0xff] }
 0x145   : > { %1065 = vmatpush.msrb.mxu3 %v986_v15 }
 0x146   : > { %1119 = vmatpush.msra.mxu2 %v983_v8  ;;  %1216 = vmatpush.msra.mxu0 %v1187_v59  ;;  %v2788_v8 = vld [vmem:[%s4854_s4 + $0x1e8] sm:$0xff] }
 0x147   : > { %1066 = vmatpush.msrb.mxu3 %v984_v16  ;;  %2736 = vmatmul.msk.f32.gmra.mxu2 %vm615_vm1, %v1001_v52 }
 0x148   : > { %2739 = vmatmul.msk.f32.vlgmr.msrb.gmra.mxu3 %vm615_vm1, %v999_v40  ;;  %1307 = vmatpush.msrb.mxu2 %v2774_v27  ;;  %v1182_v40 = vld [vmem:[%s4854_s4 + $0x20] sm:$0xff] }
 0x149   : > { %1144 = vmatpush.msra.mxu3 %v998_v61  ;;  %1217 = vmatpush.msra.mxu0 %v1186_v29  ;;  %v2786_v61 = vld [vmem:[%s4854_s4 + $0x1d8] sm:$0xff] }
 0x14a   : > { %1308 = vmatpush.msrb.mxu2 %v2773_v37  ;;  %v2776_v37 = vld [vmem:[%s4854_s4 + $0x188] sm:$0xff] }
 0x14b   : > { %1145 = vmatpush.msra.mxu3 %v996_v34  ;;  %1218 = vmatpush.msra.mxu0 %v1185_v18  ;;  %v2785_v34 = vld [vmem:[%s4854_s4 + $0x1d0] sm:$0xff] }
 0x14c   : > { %1309 = vmatpush.msrb.mxu2 %v2772_v35  ;;  %v2775_v35 = vld [vmem:[%s4854_s4 + $0x180] sm:$0xff] }
 0x14d   : > { %1146 = vmatpush.msra.mxu3 %v994_v53  ;;  %1219 = vmatpush.msra.mxu0 %v1184_v0  ;;  %v2760_v53 = vld [vmem:[%s4854_s4 + $0x108] sm:$0xff] }
 0x14e   : > { %1310 = vmatpush.msrb.mxu2 %v2771_v54 }
 0x14f   : > { %1147 = vmatpush.msra.mxu3 %v992_v48  ;;  %2737 = vmatmul.msk.f32.gmra.mxu2 %vm615_vm1, %v1002_v19  ;;  %v2759_v48 = vld [vmem:[%s4854_s4 + $0x100] sm:$0xff] }
 0x150   : > { %2740 = vmatmul.msk.f32.gmra.mxu3 %vm615_vm1, %v1000_v13  ;;  %1311 = vmatpush.msrb.mxu2 %v2770_v62  ;;  %v1178_v13 = vld [vmem:[%s4854_s4] sm:$0xff] }
 0x151   : > { %1148 = vmatpush.msra.mxu3 %v990_v28  ;;  %1220 = vmatpush.msra.mxu0 %v1183_v4  ;;  %v1201_v28 = vld [vmem:[%s4854_s4 + $0xb8] sm:$0xff] }
 0x152   : > { %1312 = vmatpush.msrb.mxu2 %v2769_v50  ;;  %1250 = vmatpush.msrb.mxu1 %v1201_v28  ;;  %v2817_v28 = vld [vmem:[%s4855_s5 + $0x1d0] sm:$0xff] }
 0x153   : > { %1149 = vmatpush.msra.mxu3 %v988_v56  ;;  %1221 = vmatpush.msra.mxu0 %v1182_v40  ;;  %v1200_v56 = vld [vmem:[%s4854_s4 + $0xb0] sm:$0xff] }
 0x154   : > { %1313 = vmatpush.msrb.mxu2 %v2768_v31  ;;  %1251 = vmatpush.msrb.mxu1 %v1200_v56  ;;  %v1390_v56 = vld [vmem:[%s4855_s5 + $0x70] sm:$0xff] }
 0x155   : > { %1150 = vmatpush.msra.mxu3 %v986_v15  ;;  %1222 = vmatpush.msra.mxu0 %v1181_v9 }
 0x156   : > { %1314 = vmatpush.msrb.mxu2 %v2767_v46 }
 0x157   : > { %1151 = vmatpush.msra.mxu3 %v984_v16  ;;  %2738 = vmatmul.msk.f32.gmra.mxu2 %vm615_vm1, %v1003_v20  ;;  %v1199_v16 = vld [vmem:[%s4854_s4 + $0xa8] sm:$0xff] }
 0x158   : > { %2741 = vmatmul.msk.f32.gmra.mxu3 %vm615_vm1, %v1001_v52  ;;  %1315 = vmatpush.msrb.mxu2 %v2766_v45  ;;  %v1406_v45 = vld [vmem:[%s4855_s5 + $0xf0] sm:$0xff] }
 0x159   : > { %1339 = vmatpush.msrb.mxu3 %v2790_v51  ;;  %1223 = vmatpush.msra.mxu0 %v1180_v6  ;;  %v1407_v51 = vld [vmem:[%s4855_s5 + $0xf8] sm:$0xff]  ;;  %v1401_v6 = vld [vmem:[%s4855_s5 + $0xc8] sm:$0xff] }
 0x15a   : > { %1316 = vmatpush.msrb.mxu2 %v2765_v44  ;;  %1252 = vmatpush.msrb.mxu1 %v1199_v16  ;;  %v1388_v16 = vld [vmem:[%s4855_s5 + $0x60] sm:$0xff] }
 0x15b   : > { %1340 = vmatpush.msrb.mxu3 %v2789_v55  ;;  %1224 = vmatpush.msra.mxu0 %v1179_v3  ;;  %v1405_v55 = vld [vmem:[%s4855_s5 + $0xe8] sm:$0xff]  ;;  %v2821_v3 = vld [vmem:[%s4855_s5 + $0x1f0] sm:$0xff] }
 0x15c   : > { %1317 = vmatpush.msrb.mxu2 %v2764_v7 }
 0x15d   : > { %1341 = vmatpush.msrb.mxu3 %v2788_v8  ;;  %1225 = vmatpush.msra.mxu0 %v1178_v13  ;;  %v2819_v13 = vld [vmem:[%s4855_s5 + $0x1e0] sm:$0xff] }
 0x15e   : > { %1318 = vmatpush.msrb.mxu2 %v2763_v2 }
 0x15f   : > { %2749 = vmatmul.msk.f32.vlgmr.msra.gmra.mxu2 %vm615_vm1, %v2744_v21  ;;  %1342 = vmatpush.msrb.mxu3 %v2787_v42 }
 0x160   : > { %2742 = vmatmul.msk.f32.gmra.mxu3 %vm615_vm1, %v1002_v19  ;;  %1319 = vmatpush.msrb.mxu2 %v2762_v36  ;;  %v2780_v19 = vld [vmem:[%s4854_s4 + $0x1a8] sm:$0xff]  ;;  %v1403_v36 = vld [vmem:[%s4855_s5 + $0xd8] sm:$0xff] }
 0x161   : > { %1343 = vmatpush.msrb.mxu3 %v2786_v61  ;;  %v1400_v61 = vld [vmem:[%s4855_s5 + $0xc0] sm:$0xff]  ;;  %1459 = vmatpush.msrb.mxu0 %v2821_v3 }
 0x162   : > { %1320 = vmatpush.msrb.mxu2 %v2761_v12  ;;  %v1399_v12 = vld [vmem:[%s4855_s5 + $0xb8] sm:$0xff] }
 0x163   : > { %1344 = vmatpush.msrb.mxu3 %v2785_v34  ;;  %v1396_v34 = vld [vmem:[%s4855_s5 + $0xa0] sm:$0xff]  ;;  %1460 = vmatpush.msrb.mxu0 %v2819_v13 }
 0x164   : > { %1321 = vmatpush.msrb.mxu2 %v2760_v53  ;;  %v1394_v53 = vld [vmem:[%s4855_s5 + $0x90] sm:$0xff] }
 0x165   : > { %1345 = vmatpush.msrb.mxu3 %v2784_v63  ;;  %v1395_v63 = vld [vmem:[%s4855_s5 + $0x98] sm:$0xff]  ;;  %1461 = vmatpush.msrb.mxu0 %v2817_v28 }
 0x166   : > { %1322 = vmatpush.msrb.mxu2 %v2759_v48  ;;  %v1392_v48 = vld [vmem:[%s4855_s5 + $0x80] sm:$0xff]  ;;  %v2834_v28 = vld [vmem:[%s4855_s5 + $0x258] sm:$0xff] }
 0x167   : > { %2750 = vmatmul.msk.f32.gmra.mxu2 %vm615_vm1, %v2745_v22  ;;  %1346 = vmatpush.msrb.mxu3 %v2783_v60  ;;  %v1393_v60 = vld [vmem:[%s4855_s5 + $0x88] sm:$0xff] }
 0x168   : > { %2743 = vmatmul.msk.f32.gmra.mxu3 %vm615_vm1, %v1003_v20  ;;  %v1198_v20 = vld [vmem:[%s4854_s4 + $0xa0] sm:$0xff]  ;;  %1517 = vmatpush.msra.mxu2 %v1406_v45  ;;  %v2801_v45 = vld [vmem:[%s4855_s5 + $0x150] sm:$0xff] }
 0x169   : > { %1347 = vmatpush.msrb.mxu3 %v2782_v43  ;;  %1253 = vmatpush.msrb.mxu1 %v1198_v20  ;;  %v2818_v43 = vld [vmem:[%s4855_s5 + $0x1d8] sm:$0xff]  ;;  %v2813_v20 = vld [vmem:[%s4855_s5 + $0x1b0] sm:$0xff] }
 0x16a   : > { %1518 = vmatpush.msra.mxu2 %v1404_v47  ;;  %v2799_v47 = vld [vmem:[%s4855_s5 + $0x140] sm:$0xff] }
 0x16b   : > { %1348 = vmatpush.msrb.mxu3 %v2781_v14  ;;  %v1391_v14 = vld [vmem:[%s4855_s5 + $0x78] sm:$0xff] }
 0x16c   : > { %1519 = vmatpush.msra.mxu2 %v1402_v10  ;;  %v2853_v10 = vld [vmem:[%s4855_s5 + $0x2f0] sm:$0xff] }
 0x16d   : > { %1349 = vmatpush.msrb.mxu3 %v2780_v19  ;;  %v1389_v19 = vld [vmem:[%s4855_s5 + $0x68] sm:$0xff] }
 0x16e   : > { %1520 = vmatpush.msra.mxu2 %v1400_v61  ;;  %v2851_v61 = vld [vmem:[%s4855_s5 + $0x2e0] sm:$0xff] }
 0x16f   : > { %2751 = vmatmul.msk.f32.gmra.mxu2 %vm615_vm1, %v2746_v23 }
 0x170   : > { %2754 = vmatmul.msk.f32.vlgmr.msra.gmra.mxu3 %vm615_vm1, %v2744_v21  ;;  %v2779_v21 = vld [vmem:[%s4854_s4 + $0x1a0] sm:$0xff]  ;;  %1521 = vmatpush.msra.mxu2 %v1398_v11  ;;  %v2849_v11 = vld [vmem:[%s4855_s5 + $0x2d0] sm:$0xff] }
 0x171   : > { %1350 = vmatpush.msrb.mxu3 %v2779_v21  ;;  %v2814_v21 = vld [vmem:[%s4855_s5 + $0x1b8] sm:$0xff] }
 0x172   : > { %1522 = vmatpush.msra.mxu2 %v1396_v34  ;;  %v2847_v34 = vld [vmem:[%s4855_s5 + $0x2c0] sm:$0xff] }
 0x174   : > { %1523 = vmatpush.msra.mxu2 %v1394_v53  ;;  %v2845_v53 = vld [vmem:[%s4855_s5 + $0x2b0] sm:$0xff] }
 0x176   : > { %1524 = vmatpush.msra.mxu2 %v1392_v48  ;;  %v2836_v48 = vld [vmem:[%s4855_s5 + $0x268] sm:$0xff] }
 0x177   : > { %2752 = vmatmul.msk.f32.gmra.mxu2 %vm615_vm1, %v2747_v24 }
 0x178   : > { %2755 = vmatmul.msk.f32.gmra.mxu3 %vm615_vm1, %v2745_v22  ;;  %v1197_v22 = vld [vmem:[%s4854_s4 + $0x98] sm:$0xff]  ;;  %1525 = vmatpush.msra.mxu2 %v1390_v56  ;;  %v2832_v56 = vld [vmem:[%s4855_s5 + $0x248] sm:$0xff] }
 0x179   : > { %1254 = vmatpush.msrb.mxu1 %v1197_v22  ;;  %v1386_v22 = vld [vmem:[%s4855_s5 + $0x50] sm:$0xff] }
 0x17a   : > { %1526 = vmatpush.msra.mxu2 %v1388_v16 }
 0x17c   : > { %1527 = vmatpush.msra.mxu2 %v1386_v22 }
 0x17f   : > { %2753 = vmatmul.msk.f32.gmra.mxu2 %vm615_vm1, %v2748_v25 }
 0x180   : > { %2756 = vmatmul.msk.f32.gmra.mxu3 %vm615_vm1, %v2746_v23  ;;  %v2778_v23 = vld [vmem:[%s4854_s4 + $0x198] sm:$0xff] }
 0x181   : > { %1351 = vmatpush.msrb.mxu3 %v2778_v23  ;;  %v1387_v23 = vld [vmem:[%s4855_s5 + $0x58] sm:$0xff] }
 0x188   : > { %2757 = vmatmul.msk.f32.gmra.mxu3 %vm615_vm1, %v2747_v24  ;;  %v1196_v24 = vld [vmem:[%s4854_s4 + $0x90] sm:$0xff] }
 0x189   : > { %1255 = vmatpush.msrb.mxu1 %v1196_v24  ;;  %v2811_v24 = vld [vmem:[%s4855_s5 + $0x1a0] sm:$0xff] }
 0x18b   : > { %1256 = vmatpush.msrb.mxu1 %v1195_v17  ;;  %v2809_v17 = vld [vmem:[%s4855_s5 + $0x190] sm:$0xff] }
 0x18d   : > { %1257 = vmatpush.msrb.mxu1 %v1194_v39  ;;  %v1382_v39 = vld [vmem:[%s4855_s5 + $0x30] sm:$0xff] }
 0x18f   : > { %1488 = vmatpush.msra.mxu1 %v2822_v32 }
 0x190   : > { %2758 = vmatmul.msk.f32.gmra.mxu3 %vm615_vm1, %v2748_v25  ;;  %v2777_v25 = vld [vmem:[%s4854_s4 + $0x190] sm:$0xff] }
 0x191   : > { %1352 = vmatpush.msrb.mxu3 %v2777_v25  ;;  %1489 = vmatpush.msra.mxu1 %v2820_v30  ;;  %v2812_v25 = vld [vmem:[%s4855_s5 + $0x1a8] sm:$0xff]  ;;  %v2843_v30 = vld [vmem:[%s4855_s5 + $0x2a0] sm:$0xff] }
 0x193   : > { %1353 = vmatpush.msrb.mxu3 %v2776_v37  ;;  %1490 = vmatpush.msra.mxu1 %v2818_v43  ;;  %v2810_v37 = vld [vmem:[%s4855_s5 + $0x198] sm:$0xff]  ;;  %v2839_v43 = vld [vmem:[%s4855_s5 + $0x280] sm:$0xff] }
 0x195   : > { %1354 = vmatpush.msrb.mxu3 %v2775_v35  ;;  %v1383_v35 = vld [vmem:[%s4855_s5 + $0x38] sm:$0xff] }
 0x197   : > { %1546 = vmatpush.msra.mxu3 %v1407_v51  ;;  %v2802_v51 = vld [vmem:[%s4855_s5 + $0x158] sm:$0xff] }
 0x199   : > { %1547 = vmatpush.msra.mxu3 %v1405_v55  ;;  %v2800_v55 = vld [vmem:[%s4855_s5 + $0x148] sm:$0xff] }
 0x19b   : > { %1548 = vmatpush.msra.mxu3 %v1403_v36  ;;  %v2846_v36 = vld [vmem:[%s4855_s5 + $0x2b8] sm:$0xff] }
 0x19d   : > { %1549 = vmatpush.msra.mxu3 %v1401_v6  ;;  %v2844_v6 = vld [vmem:[%s4855_s5 + $0x2a8] sm:$0xff] }
 0x19f   : > { %1550 = vmatpush.msra.mxu3 %v1399_v12  ;;  %v2842_v12 = vld [vmem:[%s4855_s5 + $0x298] sm:$0xff] }
 0x1ba   : > { %v3724_v1 = vpop.f32.mrf.mxu2 }
 0x1c2   : > { %v3774_v57 = vpop.f32.mrf.mxu2 }
 0x1ca   : > { %v1042_v15 = vpop.f32.mrf.mxu2 }
 0x1cb   : > { %v1068_v52 = vpop.f32.mrf.mxu3 }
 0x1d2   : > { %v1045_v26 = vpop.f32.mrf.mxu2 }
 0x1d3   : > { %v1071_v27 = vpop.f32.mrf.mxu3 }
 0x1da   : > { %v1048_v41 = vpop.f32.mrf.mxu2 }
 0x1db   : > { %v1074_v54 = vpop.f32.mrf.mxu3 }
 0x1e2   : > { %v1121_v58 = vpop.f32.mrf.mxu2 }
 0x1e3   : > { %v1077_v62 = vpop.f32.mrf.mxu3  ;;  %v1168_v33 = vmax.f32 %v3724_v1, %v1121_v58  ;;  %v1380_v58 = vld [vmem:[%s4855_s5 + $0x20] sm:$0xff] }
 0x1e5   : > { %1226 = vmatmul.f32.vlgmr.msra.gmra.mxu0 %v1168_v33  ;;  %1323 = vmatmul.f32.vlgmr.msrb.gmra.mxu2 %v1168_v33  ;;  %v2805_v33 = vld [vmem:[%s4855_s5 + $0x170] sm:$0xff] }
 0x1ea   : > { %v1124_v50 = vpop.f32.mrf.mxu2 }
 0x1eb   : > { %v1080_v59 = vpop.f32.mrf.mxu3  ;;  %v1170_v31 = vmax.f32 %v3774_v57, %v1124_v50  ;;  %v1397_v57 = vld [vmem:[%s4855_s5 + $0xa8] sm:$0xff]  ;;  %v2806_v50 = vld [vmem:[%s4855_s5 + $0x178] sm:$0xff] }
 0x1ec   : > { %1551 = vmatpush.msra.mxu3 %v1397_v57  ;;  %v2840_v57 = vld [vmem:[%s4855_s5 + $0x288] sm:$0xff] }
 0x1ed   : > { %1229 = vmatmul.f32.gmra.mxu0 %v1170_v31  ;;  %1326 = vmatmul.f32.gmra.mxu2 %v1170_v31  ;;  %v1379_v31 = vld [vmem:[%s4855_s5 + $0x18] sm:$0xff] }
 0x1ee   : > { %1552 = vmatpush.msra.mxu3 %v1395_v63  ;;  %v2838_v63 = vld [vmem:[%s4855_s5 + $0x278] sm:$0xff] }
 0x1f0   : > { %1553 = vmatpush.msra.mxu3 %v1393_v60  ;;  %v2841_v60 = vld [vmem:[%s4855_s5 + $0x290] sm:$0xff] }
 0x1f2   : > { %v1127_v29 = vpop.f32.mrf.mxu2  ;;  %1554 = vmatpush.msra.mxu3 %v1391_v14 }
 0x1f3   : > { %v1172_v46 = vmax.f32 %v1042_v15, %v1127_v29  ;;  %v1153_v49 = vpop.f32.mrf.mxu3  ;;  %v2815_v15 = vld [vmem:[%s4855_s5 + $0x1c0] sm:$0xff] }
 0x1f4   : > { %v1169_v18 = vmax.f32 %v1068_v52, %v1153_v49  ;;  %v2816_v52 = vld [vmem:[%s4855_s5 + $0x1c8] sm:$0xff]  ;;  %1462 = vmatpush.msrb.mxu0 %v2815_v15  ;;  %1555 = vmatpush.msra.mxu3 %v1389_v19  ;;  %v2803_v29 = vld [vmem:[%s4855_s5 + $0x160] sm:$0xff]  ;;  %v2837_v19 = vld [vmem:[%s4855_s5 + $0x270] sm:$0xff] }
 0x1f5   : > { %1232 = vmatmul.f32.gmra.mxu0 %v1172_v46  ;;  %1329 = vmatmul.f32.gmra.mxu2 %v1172_v46  ;;  %v2804_v46 = vld [vmem:[%s4855_s5 + $0x168] sm:$0xff]  ;;  %v1376_v49 = vld [vmem:[%s4855_s5] sm:$0xff] }
 0x1f6   : > { %1258 = vmatmul.f32.vlgmr.msrb.gmra.mxu1 %v1169_v18  ;;  %1355 = vmatmul.f32.vlgmr.msrb.gmra.mxu3 %v1169_v18  ;;  %v1377_v18 = vld [vmem:[%s4855_s5 + $0x8] sm:$0xff] }
 0x1f7   : > { %1491 = vmatpush.msra.mxu1 %v2816_v52  ;;  %1463 = vmatpush.msrb.mxu0 %v2813_v20  ;;  %v2830_v20 = vld [vmem:[%s4855_s5 + $0x238] sm:$0xff] }
 0x1f8   : > { %1556 = vmatpush.msra.mxu3 %v1387_v23 }
 0x1f9   : > { %1492 = vmatpush.msra.mxu1 %v2814_v21  ;;  %1464 = vmatpush.msrb.mxu0 %v2811_v24  ;;  %v2835_v24 = vld [vmem:[%s4855_s5 + $0x260] sm:$0xff] }
 0x1fa   : > { %v1130_v0 = vpop.f32.mrf.mxu2 }
 0x1fb   : > { %v1174_v44 = vmax.f32 %v1045_v26, %v1130_v0  ;;  %v1156_v1 = vpop.f32.mrf.mxu3  ;;  %v1384_v26 = vld [vmem:[%s4855_s5 + $0x40] sm:$0xff]  ;;  %1493 = vmatpush.msra.mxu1 %v2812_v25  ;;  %1465 = vmatpush.msrb.mxu0 %v2809_v17  ;;  %v2797_v0 = vld [vmem:[%s4855_s5 + $0x130] sm:$0xff]  ;;  %v2828_v25 = vld [vmem:[%s4855_s5 + $0x228] sm:$0xff] }
 0x1fc   : > { %v1171_v4 = vmax.f32 %v1071_v27, %v1156_v1  ;;  %v1385_v27 = vld [vmem:[%s4855_s5 + $0x48] sm:$0xff]  ;;  %1528 = vmatpush.msra.mxu2 %v1384_v26  ;;  %v2854_v1 = vld [vmem:[%s4855_s5 + $0x2f8] sm:$0xff]  ;;  %v2833_v26 = vld [vmem:[%s4855_s5 + $0x250] sm:$0xff] }
 0x1fd   : > { %1235 = vmatmul.f32.gmra.mxu0 %v1174_v44  ;;  %1332 = vmatmul.f32.gmra.mxu2 %v1174_v44  ;;  %v2798_v44 = vld [vmem:[%s4855_s5 + $0x138] sm:$0xff]  ;;  %v2831_v17 = vld [vmem:[%s4855_s5 + $0x240] sm:$0xff] }
 0x1fe   : > { %1261 = vmatmul.f32.gmra.mxu1 %v1171_v4  ;;  %1358 = vmatmul.f32.gmra.mxu3 %v1171_v4  ;;  %v2795_v4 = vld [vmem:[%s4855_s5 + $0x120] sm:$0xff] }
 0x1ff   : > { %1557 = vmatpush.msra.mxu3 %v1385_v27  ;;  %1494 = vmatpush.msra.mxu1 %v2810_v37  ;;  %v2826_v27 = vld [vmem:[%s4855_s5 + $0x218] sm:$0xff]  ;;  %v2824_v37 = vld [vmem:[%s4855_s5 + $0x208] sm:$0xff] }
 0x200   : > { %1529 = vmatpush.msra.mxu2 %v1382_v39 }
 0x201   : > { %1558 = vmatpush.msra.mxu3 %v1383_v35 }
 0x202   : > { %v1133_v5 = vpop.f32.mrf.mxu2  ;;  %1530 = vmatpush.msra.mxu2 %v1380_v58  ;;  %v2827_v58 = vld [vmem:[%s4855_s5 + $0x220] sm:$0xff] }
 0x203   : > { %v1176_v7 = vmax.f32 %v1048_v41, %v1133_v5  ;;  %v1159_v8 = vpop.f32.mrf.mxu3  ;;  %v2807_v41 = vld [vmem:[%s4855_s5 + $0x180] sm:$0xff]  ;;  %v2796_v5 = vld [vmem:[%s4855_s5 + $0x128] sm:$0xff] }
 0x204   : > { %v1173_v40 = vmax.f32 %v1074_v54, %v1159_v8  ;;  %v2808_v54 = vld [vmem:[%s4855_s5 + $0x188] sm:$0xff]  ;;  %1466 = vmatpush.msrb.mxu0 %v2807_v41  ;;  %v2793_v8 = vld [vmem:[%s4855_s5 + $0x110] sm:$0xff] }
 0x205   : > { %1238 = vmatmul.f32.gmra.mxu0 %v1176_v7  ;;  %1335 = vmatmul.f32.gmra.mxu2 %v1176_v7  ;;  %v2852_v7 = vld [vmem:[%s4855_s5 + $0x2e8] sm:$0xff] }
 0x206   : > { %1264 = vmatmul.f32.gmra.mxu1 %v1173_v40  ;;  %1361 = vmatmul.f32.gmra.mxu3 %v1173_v40  ;;  %v2794_v40 = vld [vmem:[%s4855_s5 + $0x118] sm:$0xff] }
 0x207   : > { %1495 = vmatpush.msra.mxu1 %v2808_v54  ;;  %1467 = vmatpush.msrb.mxu0 %v2805_v33  ;;  %v2829_v54 = vld [vmem:[%s4855_s5 + $0x230] sm:$0xff] }
 0x209   : > { %1496 = vmatpush.msra.mxu1 %v2806_v50  ;;  %1468 = vmatpush.msrb.mxu0 %v2803_v29 }
 0x20b   : > { %v1162_v38 = vpop.f32.mrf.mxu3  ;;  %1497 = vmatpush.msra.mxu1 %v2804_v46  ;;  %1469 = vmatpush.msrb.mxu0 %v2801_v45 }
 0x20c   : > { %v1175_v2 = vmax.f32 %v1077_v62, %v1162_v38  ;;  %v1381_v62 = vld [vmem:[%s4855_s5 + $0x28] sm:$0xff]  ;;  %v2850_v38 = vld [vmem:[%s4855_s5 + $0x2d8] sm:$0xff] }
 0x20d   : > { %1559 = vmatpush.msra.mxu3 %v1381_v62  ;;  %1498 = vmatpush.msra.mxu1 %v2802_v51 }
 0x20e   : > { %1267 = vmatmul.f32.gmra.mxu1 %v1175_v2  ;;  %1364 = vmatmul.f32.gmra.mxu3 %v1175_v2  ;;  %v2791_v2 = vld [vmem:[%s4855_s5 + $0x100] sm:$0xff] }
 0x20f   : > { %1560 = vmatpush.msra.mxu3 %v1379_v31  ;;  %1470 = vmatpush.msrb.mxu0 %v2799_v47 }
 0x210   : > { %1499 = vmatpush.msra.mxu1 %v2800_v55 }
 0x211   : > { %1561 = vmatpush.msra.mxu3 %v1377_v18  ;;  %1471 = vmatpush.msrb.mxu0 %v2797_v0 }
 0x212   : > { %1500 = vmatpush.msra.mxu1 %v2798_v44 }
 0x213   : > { %v1165_v42 = vpop.f32.mrf.mxu3  ;;  %3023 = vmatpush.msrb.mxu3 %v2854_v1  ;;  %1472 = vmatpush.msrb.mxu0 %v2795_v4 }
 0x214   : > { %v1177_v9 = vmax.f32 %v1080_v59, %v1165_v42  ;;  %v1378_v59 = vld [vmem:[%s4855_s5 + $0x10] sm:$0xff]  ;;  %1501 = vmatpush.msra.mxu1 %v2796_v5  ;;  %v2792_v42 = vld [vmem:[%s4855_s5 + $0x108] sm:$0xff] }
 0x215   : > { %1531 = vmatpush.msra.mxu2 %v1378_v59  ;;  %3024 = vmatpush.msrb.mxu3 %v2852_v7  ;;  %v2825_v59 = vld [vmem:[%s4855_s5 + $0x210] sm:$0xff] }
 0x216   : > { %1270 = vmatmul.f32.gmra.mxu1 %v1177_v9  ;;  %1367 = vmatmul.f32.gmra.mxu3 %v1177_v9  ;;  %v2848_v9 = vld [vmem:[%s4855_s5 + $0x2c8] sm:$0xff] }
 0x217   : > { %1532 = vmatpush.msra.mxu2 %v1376_v49  ;;  %1473 = vmatpush.msrb.mxu0 %v2793_v8  ;;  %v2823_v49 = vld [vmem:[%s4855_s5 + $0x200] sm:$0xff] }
 0x218   : > { %1502 = vmatpush.msra.mxu1 %v2794_v40  ;;  %3025 = vmatpush.msrb.mxu3 %v2850_v38 }
 0x219   : > { %1474 = vmatpush.msrb.mxu0 %v2791_v2 }
 0x21a   : > { %1503 = vmatpush.msra.mxu1 %v2792_v42  ;;  %3026 = vmatpush.msrb.mxu3 %v2848_v9 }
 0x21b   : > { %1621 = vmatpush.msra.mxu0 %v2853_v10 }
 0x21c   : > { %1650 = vmatpush.msrb.mxu1 %v2854_v1  ;;  %3027 = vmatpush.msrb.mxu3 %v2846_v36 }
 0x21d   : > { %1622 = vmatpush.msra.mxu0 %v2851_v61 }
 0x21e   : > { %1651 = vmatpush.msrb.mxu1 %v2852_v7  ;;  %3028 = vmatpush.msrb.mxu3 %v2844_v6 }
 0x21f   : > { %1623 = vmatpush.msra.mxu0 %v2849_v11 }
 0x220   : > { %1652 = vmatpush.msrb.mxu1 %v2850_v38  ;;  %3029 = vmatpush.msrb.mxu3 %v2842_v12 }
 0x221   : > { %1624 = vmatpush.msra.mxu0 %v2847_v34 }
 0x222   : > { %1653 = vmatpush.msrb.mxu1 %v2848_v9  ;;  %3030 = vmatpush.msrb.mxu3 %v2840_v57 }
 0x223   : > { %1625 = vmatpush.msra.mxu0 %v2845_v53 }
 0x224   : > { %1654 = vmatpush.msrb.mxu1 %v2846_v36  ;;  %3031 = vmatpush.msrb.mxu3 %v2838_v63 }
 0x225   : > { %1626 = vmatpush.msra.mxu0 %v2843_v30 }
 0x226   : > { %1655 = vmatpush.msrb.mxu1 %v2844_v6  ;;  %3032 = vmatpush.msrb.mxu3 %v2836_v48 }
 0x227   : > { %1627 = vmatpush.msra.mxu0 %v2841_v60 }
 0x228   : > { %1656 = vmatpush.msrb.mxu1 %v2842_v12  ;;  %3033 = vmatpush.msrb.mxu3 %v2834_v28 }
 0x229   : > { %1628 = vmatpush.msra.mxu0 %v2839_v43 }
 0x22a   : > { %1657 = vmatpush.msrb.mxu1 %v2840_v57  ;;  %3034 = vmatpush.msrb.mxu3 %v2832_v56 }
 0x22b   : > { %1629 = vmatpush.msra.mxu0 %v2837_v19 }
 0x22c   : > { %1658 = vmatpush.msrb.mxu1 %v2838_v63  ;;  %3035 = vmatpush.msrb.mxu3 %v2830_v20 }
 0x22d   : > { %1630 = vmatpush.msra.mxu0 %v2835_v24 }
 0x22e   : > { %1659 = vmatpush.msrb.mxu1 %v2836_v48  ;;  %3036 = vmatpush.msrb.mxu3 %v2828_v25 }
 0x22f   : > { %1631 = vmatpush.msra.mxu0 %v2833_v26  ;;  %v1687_v26 = vld [vmem:[%s4856_s6] sm:$0x3] }
 0x230   : > { %1660 = vmatpush.msrb.mxu1 %v2834_v28  ;;  %3037 = vmatpush.msrb.mxu3 %v2826_v27 }
 0x231   : > { %1632 = vmatpush.msra.mxu0 %v2831_v17  ;;  %v1690_v17 = vperm.slane %v1687_v26, 1 }
 0x232   : > { %1661 = vmatpush.msrb.mxu1 %v2832_v56  ;;  %3038 = vmatpush.msrb.mxu3 %v2824_v37 }
 0x233   : > { %1633 = vmatpush.msra.mxu0 %v2829_v54 }
 0x234   : > { %1662 = vmatpush.msrb.mxu1 %v2830_v20 }
 0x235   : > { %1634 = vmatpush.msra.mxu0 %v2827_v58 }
 0x236   : > { %1663 = vmatpush.msrb.mxu1 %v2828_v25 }
 0x237   : > { %1635 = vmatpush.msra.mxu0 %v2825_v59 }
 0x238   : > { %1664 = vmatpush.msrb.mxu1 %v2826_v27 }
 0x239   : > { %1636 = vmatpush.msra.mxu0 %v2823_v49 }
 0x23a   : > { %1665 = vmatpush.msrb.mxu1 %v2824_v37 }
 0x262   : > { %v1227_v3 = vpop.f32.mrf.mxu0 }
 0x268   : > { %v1324_v32 = vpop.f32.mrf.mxu2 }
 0x26a   : > { %v1230_v15 = vpop.f32.mrf.mxu0 }
 0x270   : > { %v1327_v21 = vpop.f32.mrf.mxu2 }
 0x272   : > { %v1233_v33 = vpop.f32.mrf.mxu0 }
 0x273   : > { %v1259_v13 = vpop.f32.mrf.mxu1 }
 0x274   : > { %v1260_v52 = vadd.f32 %v1259_v13, %v1227_v3 }
 0x278   : > { %v1330_v31 = vpop.f32.mrf.mxu2 }
 0x279   : > { %v1356_v14 = vpop.f32.mrf.mxu3 }
 0x27a   : > { %v1357_v16 = vadd.f32 %v1356_v14, %v1324_v32  ;;  %v1236_v44 = vpop.f32.mrf.mxu0 }
 0x27b   : > { %v1262_v22 = vpop.f32.mrf.mxu1 }
 0x27c   : > { %v4108_v23 = vmax.f32 %v1260_v52, %v1357_v16  ;;  %v1263_v35 = vadd.f32 %v1262_v22, %v1230_v15 }
 0x27e   : > { %1533 = vmatmul.f32.vlgmr.msra.gmra.mxu2 %v4108_v23  ;;  %1562 = vmatmul.f32.vlgmr.msra.gmra.mxu3 %v4108_v23  ;;  %v1446_v29 = vrot.slane %v4108_v23, 1  ;;  %v1608_v13 = vrot.slane %v4108_v23, 2 }
 0x280   : > { %v1333_v4 = vpop.f32.mrf.mxu2 }
 0x281   : > { %v1359_v39 = vpop.f32.mrf.mxu3 }
 0x282   : > { %v1360_v41 = vadd.f32 %v1359_v39, %v1327_v21  ;;  %v1239_v9 = vpop.f32.mrf.mxu0 }
 0x283   : > { %v1265_v62 = vpop.f32.mrf.mxu1 }
 0x284   : > { %v4136_v50 = vmax.f32 %v1263_v35, %v1360_v41  ;;  %v1266_v51 = vadd.f32 %v1265_v62, %v1233_v33 }
 0x286   : > { %1536 = vmatmul.f32.gmra.mxu2 %v4136_v50  ;;  %1565 = vmatmul.f32.gmra.mxu3 %v4136_v50  ;;  %v1447_v46 = vrot.slane %v4136_v50, 1  ;;  %v1609_v63 = vrot.slane %v4136_v50, 2 }
 0x288   : > { %v1448_v18 = vsel %vm597_vm0, %v1446_v29, %v1447_v46  ;;  %v1336_v36 = vpop.f32.mrf.mxu2  ;;  %v1610_v30 = vsel %vm829_vm2, %v1608_v13, %v1609_v63  ;;  %v2896_v13 = vld [vmem:[%s4858_s8 + $0x178] sm:$0xff] }
 0x289   : > { %v1362_v45 = vpop.f32.mrf.mxu3  ;;  %1475 = vmatmul.f32.vlgmr.msrb.gmra.mxu0 %v1448_v18  ;;  %1504 = vmatmul.f32.vlgmr.msra.gmra.mxu1 %v1448_v18 }
 0x28a   : > { %v1363_v47 = vadd.f32 %v1362_v45, %v1330_v31 }
 0x28b   : > { %v1268_v0 = vpop.f32.mrf.mxu1 }
 0x28c   : > { %v1373_v55 = vmax.f32 %v1266_v51, %v1363_v47  ;;  %v1269_v8 = vadd.f32 %v1268_v0, %v1236_v44 }
 0x28e   : > { %1539 = vmatmul.f32.gmra.mxu2 %v1373_v55  ;;  %1568 = vmatmul.f32.gmra.mxu3 %v1373_v55  ;;  %v1449_v1 = vrot.slane %v1373_v55, 1  ;;  %v1611_v48 = vrot.slane %v1373_v55, 2 }
 0x290   : > { %v1450_v5 = vsel %vm597_vm0, %v1447_v46, %v1449_v1  ;;  %v1612_v60 = vsel %vm829_vm2, %v1609_v63, %v1611_v48  ;;  %v1867_v63 = vld [vmem:[%s4858_s8 + $0xb0] sm:$0xff] }
 0x291   : > { %v1365_v7 = vpop.f32.mrf.mxu3  ;;  %1478 = vmatmul.f32.gmra.mxu0 %v1450_v5  ;;  %1507 = vmatmul.f32.gmra.mxu1 %v1450_v5 }
 0x292   : > { %v1366_v40 = vadd.f32 %v1365_v7, %v1333_v4 }
 0x293   : > { %v1271_v42 = vpop.f32.mrf.mxu1 }
 0x294   : > { %v1374_v38 = vmax.f32 %v1269_v8, %v1366_v40  ;;  %v1272_v6 = vadd.f32 %v1271_v42, %v1239_v9  ;;  %v1689_v42 = vperm.slane %v1687_v26, 0  ;;  %v1711_v26 = vld [vmem:[%s4857_s7 + $0x10] sm:$0x3] }
 0x296   : > { %1542 = vmatmul.f32.gmra.mxu2 %v1374_v38  ;;  %1571 = vmatmul.f32.gmra.mxu3 %v1374_v38  ;;  %v1451_v2 = vrot.slane %v1374_v38, 1  ;;  %v1613_v3 = vrot.slane %v1374_v38, 2 }
 0x298   : > { %v1452_v10 = vsel %vm597_vm0, %v1449_v1, %v1451_v2  ;;  %v1614_v28 = vsel %vm829_vm2, %v1611_v48, %v1613_v3 }
 0x299   : > { %v1368_v61 = vpop.f32.mrf.mxu3  ;;  %1481 = vmatmul.f32.gmra.mxu0 %v1452_v10  ;;  %1510 = vmatmul.f32.gmra.mxu1 %v1452_v10 }
 0x29a   : > { %v1369_v11 = vadd.f32 %v1368_v61, %v1336_v36 }
 0x29c   : > { %v1375_v12 = vmax.f32 %v1272_v6, %v1369_v11  ;;  %v1709_v6 = vld [vmem:[%s4857_s7] sm:$0xff]  ;;  %v2861_v11 = vld [vmem:[%s4857_s7 + $0x18] sm:$0xff] }
 0x29e   : > { %v1453_v34 = vrot.slane %v1375_v12, 1  ;;  %v1615_v57 = vrot.slane %v1375_v12, 2 }
 0x2a0   : > { %v1454_v32 = vsel %vm597_vm0, %v1451_v2, %v1453_v34  ;;  %v1616_v53 = vsel %vm829_vm2, %v1613_v3, %v1615_v57  ;;  %v1868_v3 = vld [vmem:[%s4858_s8 + $0xb8] sm:$0xff] }
 0x2a1   : > { %1484 = vmatmul.f32.gmra.mxu0 %v1454_v32  ;;  %1513 = vmatmul.f32.gmra.mxu1 %v1454_v32 }
 0x2a2   : > { %1675 = vmatmul.f32.vlgmr.msrb.gmra.mxu3 %v1616_v53 }
 0x2a9   : > { %1637 = vmatmul.f32.vlgmr.msra.gmra.mxu0 %v1610_v30  ;;  %1666 = vmatmul.f32.vlgmr.msrb.gmra.mxu1 %v1610_v30 }
 0x2b1   : > { %1640 = vmatmul.f32.gmra.mxu0 %v1612_v60  ;;  %1669 = vmatmul.f32.gmra.mxu1 %v1612_v60  ;;  %v1866_v60 = vld [vmem:[%s4858_s8 + $0xa8] sm:$0xff] }
 0x2b9   : > { %1643 = vmatmul.f32.gmra.mxu0 %v1614_v28  ;;  %1672 = vmatmul.f32.gmra.mxu1 %v1614_v28  ;;  %v2895_v28 = vld [vmem:[%s4858_s8 + $0x170] sm:$0xff] }
 0x2c1   : > { %1646 = vmatmul.f32.gmra.mxu0 %v1616_v53 }
 0x301   : > { %v1563_v43 = vpop.f32.mrf.mxu3  ;;  %v1534_v22 = vpop.f32.mrf.mxu2 }
 0x306   : > { %v1476_v56 = vpop.f32.mrf.mxu0  ;;  %v1505_v14 = vpop.f32.mrf.mxu1 }
 0x307   : > { %v1564_v29 = vadd.f32 %v1563_v43, %v1505_v14  ;;  %v1535_v2 = vadd.f32 %v1534_v22, %v1476_v56  ;;  %v1710_v56 = vld [vmem:[%s4857_s7 + $0x8] sm:$0xff]  ;;  %v2862_v14 = vld [vmem:[%s4857_s7 + $0x20] sm:$0xff]  ;;  %v2887_v22 = vld [vmem:[%s4858_s8 + $0x130] sm:$0xff] }
 0x309   : > { %v1566_v15 = vpop.f32.mrf.mxu3  ;;  %v1537_v54 = vpop.f32.mrf.mxu2 }
 0x30e   : > { %v1479_v52 = vpop.f32.mrf.mxu0  ;;  %v1508_v16 = vpop.f32.mrf.mxu1 }
 0x30f   : > { %v1567_v31 = vadd.f32 %v1566_v15, %v1508_v16  ;;  %v1538_v7 = vadd.f32 %v1537_v54, %v1479_v52  ;;  %v1860_v52 = vld [vmem:[%s4858_s8 + $0x78] sm:$0xff]  ;;  %v1855_v54 = vld [vmem:[%s4858_s8 + $0x50] sm:$0xff] }
 0x310   : > { %v2888_v16 = vld [vmem:[%s4858_s8 + $0x138] sm:$0xff] }
 0x311   : > { %v1569_v19 = vpop.f32.mrf.mxu3  ;;  %v1540_v59 = vpop.f32.mrf.mxu2 }
 0x316   : > { %v1482_v20 = vpop.f32.mrf.mxu0  ;;  %v1511_v21 = vpop.f32.mrf.mxu1 }
 0x317   : > { %v1570_v46 = vadd.f32 %v1569_v19, %v1511_v21  ;;  %v1541_v44 = vadd.f32 %v1540_v59, %v1482_v20  ;;  %v1865_v19 = vld [vmem:[%s4858_s8 + $0xa0] sm:$0xff]  ;;  %v2894_v20 = vld [vmem:[%s4858_s8 + $0x168] sm:$0xff]  ;;  %v1859_v21 = vld [vmem:[%s4858_s8 + $0x70] sm:$0xff] }
 0x318   : > { %v2881_v59 = vld [vmem:[%s4858_s8 + $0x100] sm:$0xff] }
 0x319   : > { %v1572_v23 = vpop.f32.mrf.mxu3  ;;  %v1543_v5 = vpop.f32.mrf.mxu2 }
 0x31e   : > { %v1485_v24 = vpop.f32.mrf.mxu0  ;;  %v1514_v25 = vpop.f32.mrf.mxu1 }
 0x31f   : > { %v1573_v27 = vadd.f32 %v1572_v23, %v1514_v25  ;;  %v1544_v8 = vadd.f32 %v1543_v5, %v1485_v24  ;;  %v1864_v23 = vld [vmem:[%s4858_s8 + $0x98] sm:$0xff]  ;;  %v1858_v24 = vld [vmem:[%s4858_s8 + $0x68] sm:$0xff]  ;;  %v2875_v5 = vld [vmem:[%s4858_s8 + $0xd0] sm:$0xff] }
 0x320   : > { %v2886_v25 = vld [vmem:[%s4858_s8 + $0x128] sm:$0xff] }
 0x325   : > { %v1676_v37 = vpop.f32.mrf.mxu3 }
 0x326   : > { %v1686_v39 = vadd.f32 %v1676_v37, %v1573_v27  ;;  %v1638_v35 = vpop.f32.mrf.mxu0  ;;  %v1667_v41 = vpop.f32.mrf.mxu1  ;;  %v2863_v27 = vld [vmem:[%s4857_s7 + $0x28] sm:$0x3]  ;;  %v2885_v37 = vld [vmem:[%s4858_s8 + $0x120] sm:$0xff] }
 0x327   : > { %v1680_v51 = vadd.f32 %v1667_v41, %v1564_v29  ;;  %v1679_v12 = vadd.f32 %v1638_v35, %v1535_v2  ;;  %v2884_v35 = vld [vmem:[%s4858_s8 + $0x118] sm:$0xff]  ;;  %v1863_v41 = vld [vmem:[%s4858_s8 + $0x90] sm:$0xff]  ;;  %v1845_v2 = vld [vmem:[%s4858_s8] sm:$0xff] }
 0x328   : > { %v1700_v58 = vadd.f32 %v1690_v17, %v1686_v39  ;;  %v1856_v39 = vld [vmem:[%s4858_s8 + $0x58] sm:$0xff] }
 0x329   : > { %v1694_v1 = vadd.f32 %v1690_v17, %v1680_v51  ;;  %v1693_v30 = vadd.f32 %v1689_v42, %v1679_v12  ;;  %v2880_v29 = vld [vmem:[%s4858_s8 + $0xf8] sm:$0xff]  ;;  %v1849_v51 = vld [vmem:[%s4858_s8 + $0x20] sm:$0xff]  ;;  %v2910_v12 = vld [vmem:[%s4859_s9 + $0xb0] sm:$0xff] }
 0x32a   : > { %v1708_v62 = vmax.f32 %v1700_v58, 0.0  ;;  %v2883_v58 = vld [vmem:[%s4858_s8 + $0x110] sm:$0xff] }
 0x32b   : > { %v1702_v10 = vmax.f32 %v1694_v1, 0.0  ;;  %v1701_v15 = vmax.f32 %v1693_v30, 0.0  ;;  %v2876_v1 = vld [vmem:[%s4858_s8 + $0xd8] sm:$0xff] }
 0x32c   : > { %1760 = vmatpush.msra.mxu3 %v1708_v62  ;;  %1825 = vmatpush.msra.mxu1 %v1708_v62  ;;  %v1854_v62 = vld [vmem:[%s4858_s8 + $0x48] sm:$0xff] }
 0x32e   : > { %v1641_v33 = vpop.f32.mrf.mxu0  ;;  %v1670_v50 = vpop.f32.mrf.mxu1 }
 0x32f   : > { %v1682_v49 = vadd.f32 %v1670_v50, %v1567_v31  ;;  %v1681_v36 = vadd.f32 %v1641_v33, %v1538_v7  ;;  %v2882_v33 = vld [vmem:[%s4858_s8 + $0x108] sm:$0xff]  ;;  %v1853_v50 = vld [vmem:[%s4858_s8 + $0x40] sm:$0xff]  ;;  %v1852_v31 = vld [vmem:[%s4858_s8 + $0x38] sm:$0xff] }
 0x330   : > { %v2891_v7 = vld [vmem:[%s4858_s8 + $0x150] sm:$0xff] }
 0x331   : > { %v1696_v55 = vadd.f32 %v1690_v17, %v1682_v49  ;;  %v1695_v32 = vadd.f32 %v1689_v42, %v1681_v36  ;;  %v2879_v49 = vld [vmem:[%s4858_s8 + $0xf0] sm:$0xff]  ;;  %v2889_v36 = vld [vmem:[%s4858_s8 + $0x140] sm:$0xff] }
 0x333   : > { %v1704_v40 = vmax.f32 %v1696_v55, 0.0  ;;  %v1703_v43 = vmax.f32 %v1695_v32, 0.0  ;;  %v1847_v55 = vld [vmem:[%s4858_s8 + $0x10] sm:$0xff] }
 0x336   : > { %v1644_v18 = vpop.f32.mrf.mxu0  ;;  %v1673_v45 = vpop.f32.mrf.mxu1 }
 0x337   : > { %v1684_v47 = vadd.f32 %v1673_v45, %v1570_v46  ;;  %v1683_v38 = vadd.f32 %v1644_v18, %v1541_v44  ;;  %v1851_v46 = vld [vmem:[%s4858_s8 + $0x30] sm:$0xff]  ;;  %v1850_v18 = vld [vmem:[%s4858_s8 + $0x28] sm:$0xff]  ;;  %v2893_v44 = vld [vmem:[%s4858_s8 + $0x160] sm:$0xff] }
 0x338   : > { %v2878_v45 = vld [vmem:[%s4858_s8 + $0xe8] sm:$0xff] }
 0x339   : > { %v1698_v0 = vadd.f32 %v1690_v17, %v1684_v47  ;;  %v1697_v34 = vadd.f32 %v1689_v42, %v1683_v38  ;;  %v1857_v17 = vld [vmem:[%s4858_s8 + $0x60] sm:$0xff]  ;;  %v1848_v47 = vld [vmem:[%s4858_s8 + $0x18] sm:$0xff]  ;;  %v2874_v38 = vld [vmem:[%s4858_s8 + $0xc8] sm:$0xff] }
 0x33b   : > { %v1706_v4 = vmax.f32 %v1698_v0, 0.0  ;;  %v1705_v48 = vmax.f32 %v1697_v34, 0.0  ;;  %v2877_v0 = vld [vmem:[%s4858_s8 + $0xe0] sm:$0xff]  ;;  %v2020_v34 = vld [vmem:[%s4859_s9 + $0x50] sm:$0xff] }
 0x33d   : > { %1761 = vmatpush.msra.mxu3 %v1706_v4  ;;  %1826 = vmatpush.msra.mxu1 %v1706_v4  ;;  %v2892_v4 = vld [vmem:[%s4858_s8 + $0x158] sm:$0xff] }
 0x33e   : > { %v1647_v9 = vpop.f32.mrf.mxu0 }
 0x33f   : > { %v1685_v61 = vadd.f32 %v1647_v9, %v1544_v8  ;;  %1762 = vmatpush.msra.mxu3 %v1704_v40  ;;  %1827 = vmatpush.msra.mxu1 %v1704_v40  ;;  %v1846_v8 = vld [vmem:[%s4858_s8 + $0x8] sm:$0xff] }
 0x340   : > { %v1862_v40 = vld [vmem:[%s4858_s8 + $0x88] sm:$0xff] }
 0x341   : > { %v1699_v57 = vadd.f32 %v1689_v42, %v1685_v61  ;;  %1763 = vmatpush.msra.mxu3 %v1702_v10  ;;  %1828 = vmatpush.msra.mxu1 %v1702_v10  ;;  %v1861_v42 = vld [vmem:[%s4858_s8 + $0x80] sm:$0xff]  ;;  %v2890_v9 = vld [vmem:[%s4858_s8 + $0x148] sm:$0xff] }
 0x342   : > { %2858 = vmatmul.msk.f32.vlgmr.msra.gmra.mxu3 %vm1712_vm3, %v1709_v6  ;;  %2867 = vmatmul.msk.f32.vlgmr.msra.gmra.mxu1 %vm1712_vm3, %v2861_v11  ;;  %v2873_v10 = vld [vmem:[%s4858_s8 + $0xc0] sm:$0xff] }
 0x343   : > { %v1707_v53 = vmax.f32 %v1699_v57, 0.0  ;;  %1912 = vmatpush.msrb.mxu3 %v1868_v3  ;;  %1989 = vmatpush.msrb.mxu1 %v2896_v13  ;;  %v2909_v57 = vld [vmem:[%s4859_s9 + $0xa8] sm:$0xff]  ;;  %v2018_v13 = vld [vmem:[%s4859_s9 + $0x40] sm:$0xff] }
 0x344   : > { %v2019_v3 = vld [vmem:[%s4859_s9 + $0x48] sm:$0xff] }
 0x345   : > { %1734 = vmatpush.msrb.mxu2 %v1707_v53  ;;  %1799 = vmatpush.msrb.mxu0 %v1707_v53 }
 0x346   : > { %1913 = vmatpush.msrb.mxu3 %v1867_v63  ;;  %1990 = vmatpush.msrb.mxu1 %v2895_v28  ;;  %v2908_v63 = vld [vmem:[%s4859_s9 + $0xa0] sm:$0xff] }
 0x347   : > { %1735 = vmatpush.msrb.mxu2 %v1705_v48  ;;  %1800 = vmatpush.msrb.mxu0 %v1705_v48 }
 0x348   : > { %1914 = vmatpush.msrb.mxu3 %v1866_v60  ;;  %1991 = vmatpush.msrb.mxu1 %v2894_v20 }
 0x349   : > { %1736 = vmatpush.msrb.mxu2 %v1703_v43  ;;  %1801 = vmatpush.msrb.mxu0 %v1703_v43 }
 0x34a   : > { %2859 = vmatmul.msk.f32.gmra.mxu3 %vm1712_vm3, %v1710_v56  ;;  %2868 = vmatmul.msk.f32.gmra.mxu1 %vm1712_vm3, %v2862_v14 }
 0x34b   : > { %1737 = vmatpush.msrb.mxu2 %v1701_v15  ;;  %1802 = vmatpush.msrb.mxu0 %v1701_v15 }
 0x34c   : > { %2855 = vmatmul.msk.f32.vlgmr.msrb.gmra.mxu2 %vm1712_vm3, %v1709_v6  ;;  %2864 = vmatmul.msk.f32.vlgmr.msrb.gmra.mxu0 %vm1712_vm3, %v2861_v11  ;;  %v2911_v6 = vld [vmem:[%s4859_s9 + $0xb8] sm:$0xff] }
 0x34d   : > { %1878 = vmatpush.msra.mxu2 %v1860_v52  ;;  %1955 = vmatpush.msra.mxu0 %v2888_v16  ;;  %v2021_v11 = vld [vmem:[%s4859_s9 + $0x58] sm:$0xff] }
 0x34e   : > { %1915 = vmatpush.msrb.mxu3 %v1865_v19  ;;  %1992 = vmatpush.msrb.mxu1 %v2893_v44  ;;  %v2900_v44 = vld [vmem:[%s4859_s9 + $0x60] sm:$0xff] }
 0x34f   : > { %1879 = vmatpush.msra.mxu2 %v1859_v21  ;;  %1956 = vmatpush.msra.mxu0 %v2887_v22 }
 0x350   : > { %1916 = vmatpush.msrb.mxu3 %v1864_v23  ;;  %1993 = vmatpush.msrb.mxu1 %v2892_v4  ;;  %v2916_v4 = vld [vmem:[%s4859_s9 + $0xc0] sm:$0xff] }
 0x351   : > { %1880 = vmatpush.msra.mxu2 %v1858_v24  ;;  %1957 = vmatpush.msra.mxu0 %v2886_v25  ;;  %v2017_v24 = vld [vmem:[%s4859_s9 + $0x38] sm:$0xff]  ;;  %v2016_v25 = vld [vmem:[%s4859_s9 + $0x30] sm:$0xff] }
 0x352   : > { %2860 = vmatmul.msk.f32.gmra.mxu3 %vm1712_vm3, %v1711_v26  ;;  %2869 = vmatmul.msk.f32.gmra.mxu1 %vm1712_vm3, %v2863_v27 }
 0x353   : > { %1881 = vmatpush.msra.mxu2 %v1857_v17  ;;  %1958 = vmatpush.msra.mxu0 %v2885_v37  ;;  %v2926_v17 = vld [vmem:[%s4859_s9 + $0x110] sm:$0xff]  ;;  %v2014_v37 = vld [vmem:[%s4859_s9 + $0x20] sm:$0xff] }
 0x354   : > { %2856 = vmatmul.msk.f32.gmra.mxu2 %vm1712_vm3, %v1710_v56  ;;  %2865 = vmatmul.msk.f32.gmra.mxu0 %vm1712_vm3, %v2862_v14 }
 0x355   : > { %1882 = vmatpush.msra.mxu2 %v1856_v39  ;;  %1959 = vmatpush.msra.mxu0 %v2884_v35  ;;  %v2925_v39 = vld [vmem:[%s4859_s9 + $0x108] sm:$0xff]  ;;  %v2013_v35 = vld [vmem:[%s4859_s9 + $0x18] sm:$0xff] }
 0x356   : > { %1917 = vmatpush.msrb.mxu3 %v1863_v41  ;;  %1994 = vmatpush.msrb.mxu1 %v2891_v7  ;;  %v2924_v41 = vld [vmem:[%s4859_s9 + $0x100] sm:$0xff] }
 0x357   : > { %1883 = vmatpush.msra.mxu2 %v1855_v54  ;;  %1960 = vmatpush.msra.mxu0 %v2883_v58  ;;  %v2012_v54 = vld [vmem:[%s4859_s9 + $0x10] sm:$0xff]  ;;  %v2907_v58 = vld [vmem:[%s4859_s9 + $0x98] sm:$0xff] }
 0x358   : > { %1918 = vmatpush.msrb.mxu3 %v1862_v40  ;;  %1995 = vmatpush.msrb.mxu1 %v2890_v9 }
 0x359   : > { %1884 = vmatpush.msra.mxu2 %v1854_v62  ;;  %1961 = vmatpush.msra.mxu0 %v2882_v33  ;;  %v2923_v62 = vld [vmem:[%s4859_s9 + $0xf8] sm:$0xff]  ;;  %v2011_v33 = vld [vmem:[%s4859_s9 + $0x8] sm:$0xff] }
 0x35a   : > { %1919 = vmatpush.msrb.mxu3 %v1861_v42  ;;  %1996 = vmatpush.msrb.mxu1 %v2889_v36 }
 0x35b   : > { %1885 = vmatpush.msra.mxu2 %v1853_v50  ;;  %1962 = vmatpush.msra.mxu0 %v2881_v59  ;;  %v2906_v50 = vld [vmem:[%s4859_s9 + $0x90] sm:$0xff] }
 0x35c   : > { %2857 = vmatmul.msk.f32.gmra.mxu2 %vm1712_vm3, %v1711_v26  ;;  %2866 = vmatmul.msk.f32.gmra.mxu0 %vm1712_vm3, %v2863_v27  ;;  %v2927_v26 = vld [vmem:[%s4859_s9 + $0x118] sm:$0xff]  ;;  %v2015_v27 = vld [vmem:[%s4859_s9 + $0x28] sm:$0xff]  ;;  %v2922_v59 = vld [vmem:[%s4859_s9 + $0xf0] sm:$0xff] }
 0x35d   : > { %1886 = vmatpush.msra.mxu2 %v1852_v31  ;;  %1963 = vmatpush.msra.mxu0 %v2880_v29  ;;  %v2010_v31 = vld [vmem:[%s4859_s9] sm:$0xff]  ;;  %v2905_v29 = vld [vmem:[%s4859_s9 + $0x88] sm:$0xff] }
 0x35e   : > { %2052 = vmatpush.msra.mxu3 %v2911_v6  ;;  %2124 = vmatpush.msra.mxu1 %v2927_v26  ;;  %v2945_v26 = vld [vmem:[%s4862_s12 + $0xe0] sm:$0xff] }
 0x35f   : > { %1887 = vmatpush.msra.mxu2 %v1851_v46  ;;  %1964 = vmatpush.msra.mxu0 %v2879_v49  ;;  %v2904_v46 = vld [vmem:[%s4859_s9 + $0x80] sm:$0xff]  ;;  %v2921_v49 = vld [vmem:[%s4859_s9 + $0xe8] sm:$0xff] }
 0x360   : > { %2053 = vmatpush.msra.mxu3 %v2910_v12  ;;  %2125 = vmatpush.msra.mxu1 %v2926_v17  ;;  %v2944_v17 = vld [vmem:[%s4862_s12 + $0xd8] sm:$0xff] }
 0x361   : > { %1888 = vmatpush.msra.mxu2 %v1850_v18  ;;  %1965 = vmatpush.msra.mxu0 %v2878_v45  ;;  %v2920_v18 = vld [vmem:[%s4859_s9 + $0xe0] sm:$0xff]  ;;  %v2903_v45 = vld [vmem:[%s4859_s9 + $0x78] sm:$0xff] }
 0x362   : > { %2054 = vmatpush.msra.mxu3 %v2909_v57  ;;  %2126 = vmatpush.msra.mxu1 %v2925_v39  ;;  %v2943_v39 = vld [vmem:[%s4862_s12 + $0xd0] sm:$0xff] }
 0x363   : > { %1889 = vmatpush.msra.mxu2 %v1849_v51  ;;  %1966 = vmatpush.msra.mxu0 %v2877_v0  ;;  %v2919_v51 = vld [vmem:[%s4859_s9 + $0xd8] sm:$0xff]  ;;  %v2901_v0 = vld [vmem:[%s4859_s9 + $0x68] sm:$0xff] }
 0x364   : > { %2055 = vmatpush.msra.mxu3 %v2908_v63  ;;  %2127 = vmatpush.msra.mxu1 %v2924_v41  ;;  %v2213_v41 = vld [vmem:[%s4862_s12 + $0x48] sm:$0xff] }
 0x365   : > { %1890 = vmatpush.msra.mxu2 %v1848_v47  ;;  %1967 = vmatpush.msra.mxu0 %v2876_v1  ;;  %v2902_v47 = vld [vmem:[%s4859_s9 + $0x70] sm:$0xff]  ;;  %v2917_v1 = vld [vmem:[%s4859_s9 + $0xc8] sm:$0xff] }
 0x366   : > { %2056 = vmatpush.msra.mxu3 %v2907_v58  ;;  %2128 = vmatpush.msra.mxu1 %v2923_v62 }
 0x367   : > { %1891 = vmatpush.msra.mxu2 %v1847_v55  ;;  %1968 = vmatpush.msra.mxu0 %v2875_v5  ;;  %v2918_v55 = vld [vmem:[%s4859_s9 + $0xd0] sm:$0xff] }
 0x368   : > { %2057 = vmatpush.msra.mxu3 %v2906_v50  ;;  %2129 = vmatpush.msra.mxu1 %v2922_v59  ;;  %v2941_v50 = vld [vmem:[%s4862_s12 + $0xc0] sm:$0xff]  ;;  %v2211_v59 = vld [vmem:[%s4862_s12 + $0x38] sm:$0xff] }
 0x369   : > { %1892 = vmatpush.msra.mxu2 %v1846_v8  ;;  %1969 = vmatpush.msra.mxu0 %v2874_v38 }
 0x36a   : > { %2058 = vmatpush.msra.mxu3 %v2905_v29  ;;  %2130 = vmatpush.msra.mxu1 %v2921_v49  ;;  %v2210_v29 = vld [vmem:[%s4862_s12 + $0x30] sm:$0xff] }
 0x36b   : > { %1893 = vmatpush.msra.mxu2 %v1845_v2  ;;  %1970 = vmatpush.msra.mxu0 %v2873_v10  ;;  %v2939_v49 = vld [vmem:[%s4862_s12 + $0xb0] sm:$0xff] }
 0x36c   : > { %2059 = vmatpush.msra.mxu3 %v2904_v46  ;;  %2131 = vmatpush.msra.mxu1 %v2920_v18  ;;  %v2209_v18 = vld [vmem:[%s4862_s12 + $0x28] sm:$0xff] }
 0x36d   : > { %2079 = vmatpush.msrb.mxu2 %v2021_v11 }
 0x36e   : > { %2060 = vmatpush.msra.mxu3 %v2903_v45  ;;  %2132 = vmatpush.msra.mxu1 %v2919_v51  ;;  %v2938_v45 = vld [vmem:[%s4862_s12 + $0xa8] sm:$0xff] }
 0x36f   : > { %2080 = vmatpush.msrb.mxu2 %v2020_v34 }
 0x370   : > { %2061 = vmatpush.msra.mxu3 %v2902_v47  ;;  %2133 = vmatpush.msra.mxu1 %v2918_v55  ;;  %v2208_v55 = vld [vmem:[%s4862_s12 + $0x20] sm:$0xff] }
 0x371   : > { %2081 = vmatpush.msrb.mxu2 %v2019_v3 }
 0x372   : > { %2062 = vmatpush.msra.mxu3 %v2901_v0  ;;  %2134 = vmatpush.msra.mxu1 %v2917_v1 }
 0x373   : > { %2082 = vmatpush.msrb.mxu2 %v2018_v13 }
 0x374   : > { %2063 = vmatpush.msra.mxu3 %v2900_v44  ;;  %2135 = vmatpush.msra.mxu1 %v2916_v4  ;;  %v3079_v44 = vld [vmem:[%s4860_s10] ss:$0 sm:$0xff] }
 0x375   : > { %2083 = vmatpush.msrb.mxu2 %v2017_v24  ;;  %v2946_v24 = vld [vmem:[%s4862_s12 + $0xe8] sm:$0xff] }
 0x377   : > { %2084 = vmatpush.msrb.mxu2 %v2016_v25  ;;  %v2216_v25 = vld [vmem:[%s4862_s12 + $0x60] sm:$0xff] }
 0x379   : > { %2085 = vmatpush.msrb.mxu2 %v2015_v27  ;;  %v2215_v27 = vld [vmem:[%s4862_s12 + $0x58] sm:$0xff] }
 0x37b   : > { %2086 = vmatpush.msrb.mxu2 %v2014_v37  ;;  %v2214_v37 = vld [vmem:[%s4862_s12 + $0x50] sm:$0xff] }
 0x37d   : > { %2087 = vmatpush.msrb.mxu2 %v2013_v35 }
 0x37f   : > { %2088 = vmatpush.msrb.mxu2 %v2012_v54  ;;  %v2942_v54 = vld [vmem:[%s4862_s12 + $0xc8] sm:$0xff] }
 0x381   : > { %2089 = vmatpush.msrb.mxu2 %v2011_v33  ;;  %v2212_v33 = vld [vmem:[%s4862_s12 + $0x40] sm:$0xff] }
 0x383   : > { %2090 = vmatpush.msrb.mxu2 %v2010_v31  ;;  %v2940_v31 = vld [vmem:[%s4862_s12 + $0xb8] sm:$0xff] }
 0x3bf   : > { %v1830_v61 = vpop.f32.mrf.mxu1 }
 0x3c5   : > { %v1765_v32 = vpop.f32.mrf.mxu3 }
 0x3c6   : > { %v1840_v53 = vmax.f32 %v1765_v32, %v1830_v61 }
 0x3c7   : > { %v1833_v48 = vpop.f32.mrf.mxu1 }
 0x3c8   : > { %2870 = vmatmul.msk.f32.vlgmr.msrb.gmra.mxu3 %vm615_vm1, %v1840_v53  ;;  %2897 = vmatmul.msk.f32.vlgmr.msrb.gmra.mxu1 %vm615_vm1, %v1840_v53 }
 0x3c9   : > { %v1804_v30 = vpop.f32.mrf.mxu0 }
 0x3cd   : > { %v1768_v60 = vpop.f32.mrf.mxu3 }
 0x3ce   : > { %v1842_v28 = vmax.f32 %v1768_v60, %v1833_v48 }
 0x3cf   : > { %v1739_v43 = vpop.f32.mrf.mxu2  ;;  %v1836_v15 = vpop.f32.mrf.mxu1 }
 0x3d0   : > { %v1839_v56 = vmax.f32 %v1739_v43, %v1804_v30  ;;  %2871 = vmatmul.msk.f32.gmra.mxu3 %vm615_vm1, %v1842_v28  ;;  %2898 = vmatmul.msk.f32.gmra.mxu1 %vm615_vm1, %v1842_v28 }
 0x3d1   : > { %v1807_v14 = vpop.f32.mrf.mxu0 }
 0x3d2   : > { %1894 = vmatmul.f32.vlgmr.msra.gmra.mxu2 %v1839_v56  ;;  %1971 = vmatmul.f32.vlgmr.msra.gmra.mxu0 %v1839_v56 }
 0x3d5   : > { %v1771_v52 = vpop.f32.mrf.mxu3 }
 0x3d6   : > { %v1844_v16 = vmax.f32 %v1771_v52, %v1836_v15 }
 0x3d7   : > { %v1742_v19 = vpop.f32.mrf.mxu2 }
 0x3d8   : > { %v1841_v20 = vmax.f32 %v1742_v19, %v1807_v14  ;;  %2872 = vmatmul.msk.f32.gmra.mxu3 %vm615_vm1, %v1844_v16  ;;  %2899 = vmatmul.msk.f32.gmra.mxu1 %vm615_vm1, %v1844_v16  ;;  %v2219_v19 = vld [vmem:[%s4862_s12 + $0x78] sm:$0xff] }
 0x3d9   : > { %v1810_v21 = vpop.f32.mrf.mxu0  ;;  %2220 = vmatpush.msra.mxu2 %v2219_v19  ;;  %v2966_v19 = vld [vmem:[%s4863_s13 + $0xb8] sm:$0xff] }
 0x3da   : > { %1897 = vmatmul.f32.gmra.mxu2 %v1841_v20  ;;  %1974 = vmatmul.f32.gmra.mxu0 %v1841_v20  ;;  %v2218_v20 = vld [vmem:[%s4862_s12 + $0x70] sm:$0xff] }
 0x3db   : > { %2221 = vmatpush.msra.mxu2 %v2218_v20  ;;  %v2950_v20 = vld [vmem:[%s4863_s13 + $0x40] sm:$0xff] }
 0x3df   : > { %v1745_v22 = vpop.f32.mrf.mxu2 }
 0x3e0   : > { %v1843_v23 = vmax.f32 %v1745_v22, %v1810_v21  ;;  %v2948_v21 = vld [vmem:[%s4862_s12 + $0xf8] sm:$0xff]  ;;  %v2217_v22 = vld [vmem:[%s4862_s12 + $0x68] sm:$0xff] }
 0x3e1   : > { %2257 = vmatpush.msrb.mxu1 %v2948_v21  ;;  %2222 = vmatpush.msra.mxu2 %v2217_v22  ;;  %v2975_v21 = vld [vmem:[%s4863_s13 + $0xf8] sm:$0xff]  ;;  %v2965_v22 = vld [vmem:[%s4863_s13 + $0xb0] sm:$0xff] }
 0x3e2   : > { %1900 = vmatmul.f32.gmra.mxu2 %v1843_v23  ;;  %1977 = vmatmul.f32.gmra.mxu0 %v1843_v23  ;;  %v2947_v23 = vld [vmem:[%s4862_s12 + $0xf0] sm:$0xff] }
 0x3e3   : > { %2258 = vmatpush.msrb.mxu1 %v2947_v23  ;;  %2223 = vmatpush.msra.mxu2 %v2216_v25  ;;  %v2974_v23 = vld [vmem:[%s4863_s13 + $0xf0] sm:$0xff]  ;;  %v2963_v25 = vld [vmem:[%s4863_s13 + $0xa0] sm:$0xff] }
 0x3e5   : > { %2259 = vmatpush.msrb.mxu1 %v2946_v24  ;;  %2224 = vmatpush.msra.mxu2 %v2215_v27  ;;  %v2964_v24 = vld [vmem:[%s4863_s13 + $0xa8] sm:$0xff]  ;;  %v2961_v27 = vld [vmem:[%s4863_s13 + $0x90] sm:$0xff] }
 0x3e7   : > { %2260 = vmatpush.msrb.mxu1 %v2945_v26  ;;  %2225 = vmatpush.msra.mxu2 %v2214_v37  ;;  %v2962_v26 = vld [vmem:[%s4863_s13 + $0x98] sm:$0xff] }
 0x3e9   : > { %2261 = vmatpush.msrb.mxu1 %v2944_v17  ;;  %2226 = vmatpush.msra.mxu2 %v2213_v41  ;;  %v2993_v41 = vld [vmem:[%s4863_s13 + $0x178] sm:$0xff] }
 0x3eb   : > { %2262 = vmatpush.msrb.mxu1 %v2943_v39  ;;  %2227 = vmatpush.msra.mxu2 %v2212_v33  ;;  %v2991_v33 = vld [vmem:[%s4863_s13 + $0x168] sm:$0xff] }
 0x3ed   : > { %2263 = vmatpush.msrb.mxu1 %v2942_v54  ;;  %2228 = vmatpush.msra.mxu2 %v2211_v59  ;;  %v2983_v54 = vld [vmem:[%s4863_s13 + $0x130] sm:$0xff]  ;;  %v2981_v59 = vld [vmem:[%s4863_s13 + $0x120] sm:$0xff] }
 0x3ef   : > { %2264 = vmatpush.msrb.mxu1 %v2941_v50  ;;  %2229 = vmatpush.msra.mxu2 %v2210_v29  ;;  %v2973_v50 = vld [vmem:[%s4863_s13 + $0xe8] sm:$0xff]  ;;  %v2972_v29 = vld [vmem:[%s4863_s13 + $0xe0] sm:$0xff] }
 0x3f1   : > { %2265 = vmatpush.msrb.mxu1 %v2940_v31  ;;  %2230 = vmatpush.msra.mxu2 %v2209_v18  ;;  %v2990_v31 = vld [vmem:[%s4863_s13 + $0x160] sm:$0xff]  ;;  %v2971_v18 = vld [vmem:[%s4863_s13 + $0xd8] sm:$0xff] }
 0x3f3   : > { %2266 = vmatpush.msrb.mxu1 %v2939_v49  ;;  %2231 = vmatpush.msra.mxu2 %v2208_v55  ;;  %v2989_v49 = vld [vmem:[%s4863_s13 + $0x158] sm:$0xff]  ;;  %v2970_v55 = vld [vmem:[%s4863_s13 + $0xd0] sm:$0xff] }
 0x3f5   : > { %2267 = vmatpush.msrb.mxu1 %v2938_v45  ;;  %v2979_v45 = vld [vmem:[%s4863_s13 + $0x110] sm:$0xff] }
 0x445   : > { %v1998_v5 = vpop.f32.mrf.mxu1 }
 0x44b   : > { %v1921_v7 = vpop.f32.mrf.mxu3 }
 0x44d   : > { %v2001_v9 = vpop.f32.mrf.mxu1 }
 0x44f   : > { %v1972_v8 = vpop.f32.mrf.mxu0 }
 0x450   : > { %v1999_v2 = vadd.f32 %v1998_v5, %v1972_v8  ;;  %v2207_v5 = vld [vmem:[%s4862_s12 + $0x18] sm:$0xff]  ;;  %v2206_v8 = vld [vmem:[%s4862_s12 + $0x10] sm:$0xff] }
 0x451   : > { %2232 = vmatpush.msra.mxu2 %v2207_v5  ;;  %v2977_v5 = vld [vmem:[%s4863_s13 + $0x100] sm:$0xff] }
 0x453   : > { %v1924_v10 = vpop.f32.mrf.mxu3  ;;  %2233 = vmatpush.msra.mxu2 %v2206_v8  ;;  %v2968_v8 = vld [vmem:[%s4863_s13 + $0xc0] sm:$0xff] }
 0x455   : > { %v1895_v40 = vpop.f32.mrf.mxu2  ;;  %v2004_v53 = vpop.f32.mrf.mxu1 }
 0x456   : > { %v1922_v38 = vadd.f32 %v1921_v7, %v1895_v40 }
 0x457   : > { %v1975_v36 = vpop.f32.mrf.mxu0 }
 0x458   : > { %v2007_v42 = vmax.f32 %v1922_v38, %v1999_v2  ;;  %v2002_v11 = vadd.f32 %v2001_v9, %v1975_v36  ;;  %v2153_v9 = vld [vmem:[%s4861_s11] sm:$0xff] }
 0x459   : > { %v2937_v36 = vld [vmem:[%s4862_s12 + $0xa0] sm:$0xff] }
 0x45a   : > { %2914 = vmatmul.msk.f32.vlgmr.msrb.gmra.mxu2 %vm2043_vm4, %v2007_v42  ;;  %v2038_v34 = vrot.slane %v2007_v42, 1  ;;  %v2111_v57 = vrot.slane %v2007_v42, 2  ;;  %2268 = vmatpush.msrb.mxu1 %v2937_v36 }
 0x45b   : > { %v1927_v63 = vpop.f32.mrf.mxu3 }
 0x45d   : > { %v1898_v61 = vpop.f32.mrf.mxu2 }
 0x45e   : > { %v1925_v6 = vadd.f32 %v1924_v10, %v1898_v61  ;;  %v2931_v10 = vld [vmem:[%s4861_s11 + $0x8] sm:$0xff]  ;;  %v2936_v61 = vld [vmem:[%s4862_s12 + $0x98] sm:$0xff] }
 0x45f   : > { %v1978_v13 = vpop.f32.mrf.mxu0  ;;  %2269 = vmatpush.msrb.mxu1 %v2936_v61  ;;  %v3002_v61 = vld [vmem:[%s4863_s13 + $0x1b8] sm:$0xff] }
 0x460   : > { %v2008_v12 = vmax.f32 %v1925_v6, %v2002_v11  ;;  %v2005_v43 = vadd.f32 %v2004_v53, %v1978_v13  ;;  %v2935_v6 = vld [vmem:[%s4862_s12 + $0x90] sm:$0xff]  ;;  %v2205_v11 = vld [vmem:[%s4862_s12 + $0x8] sm:$0xff]  ;;  %v2957_v53 = vld [vmem:[%s4863_s13 + $0x78] sm:$0xff] }
 0x461   : > { %2270 = vmatpush.msrb.mxu1 %v2935_v6  ;;  %2234 = vmatpush.msra.mxu2 %v2205_v11  ;;  %v2956_v13 = vld [vmem:[%s4863_s13 + $0x70] sm:$0xff] }
 0x462   : > { %v2039_v3 = vrot.slane %v2008_v12, 1  ;;  %v2112_v32 = vrot.slane %v2008_v12, 2  ;;  %2915 = vmatmul.msk.f32.gmra.mxu2 %vm2043_vm4, %v2008_v12  ;;  %v2934_v12 = vld [vmem:[%s4862_s12 + $0x88] sm:$0xff]  ;;  %v3001_v6 = vld [vmem:[%s4863_s13 + $0x1b0] sm:$0xff] }
 0x463   : > { %2271 = vmatpush.msrb.mxu1 %v2934_v12  ;;  %v3011_v12 = vld [vmem:[%s4863_s13 + $0x1f8] sm:$0xff] }
 0x464   : > { %v2040_v30 = vsel %vm597_vm0, %v2038_v34, %v2039_v3  ;;  %v2113_v48 = vsel %vm829_vm2, %v2111_v57, %v2112_v32  ;;  %v2204_v34 = vld [vmem:[%s4862_s12] sm:$0xff] }
 0x465   : > { %v1901_v60 = vpop.f32.mrf.mxu2  ;;  %2912 = vmatmul.msk.f32.vlgmr.msra.gmra.mxu3 %vm2043_vm4, %v2040_v30  ;;  %2928 = vmatmul.msk.f32.vlgmr.msra.gmra.mxu1 %vm2043_vm4, %v2113_v48  ;;  %v2933_v57 = vld [vmem:[%s4862_s12 + $0x80] sm:$0xff]  ;;  %v2955_v30 = vld [vmem:[%s4863_s13 + $0x68] sm:$0xff] }
 0x466   : > { %v1928_v28 = vadd.f32 %v1927_v63, %v1901_v60  ;;  %2235 = vmatpush.msra.mxu2 %v2204_v34  ;;  %2272 = vmatpush.msrb.mxu1 %v2933_v57  ;;  %v2284_v63 = vld [vmem:[%s4863_s13 + $0x28] sm:$0xff]  ;;  %v2283_v48 = vld [vmem:[%s4863_s13 + $0x20] sm:$0xff] }
 0x467   : > { %v2954_v60 = vld [vmem:[%s4863_s13 + $0x60] sm:$0xff] }
 0x468   : > { %v2009_v56 = vmax.f32 %v1928_v28, %v2005_v43  ;;  %v2282_v28 = vld [vmem:[%s4863_s13 + $0x18] sm:$0xff]  ;;  %2463 = vmatpush.msra.mxu1 %v2993_v41  ;;  %v2543_v41 = vld [vmem:[%s4865_s15] sm:$0xff] }
 0x469   : > { %v2953_v43 = vld [vmem:[%s4863_s13 + $0x58] sm:$0xff] }
 0x46a   : > { %v2041_v14 = vrot.slane %v2009_v56, 1  ;;  %v2114_v15 = vrot.slane %v2009_v56, 2  ;;  %v2281_v56 = vld [vmem:[%s4863_s13 + $0x10] sm:$0xff] }
 0x46c   : > { %v2042_v52 = vsel %vm597_vm0, %v2039_v3, %v2041_v14  ;;  %v2115_v16 = vsel %vm829_vm2, %v2112_v32, %v2114_v15  ;;  %v2286_v3 = vld [vmem:[%s4863_s13 + $0x38] sm:$0xff]  ;;  %v2285_v32 = vld [vmem:[%s4863_s13 + $0x30] sm:$0xff]  ;;  %v2280_v15 = vld [vmem:[%s4863_s13 + $0x8] sm:$0xff] }
 0x46d   : > { %2913 = vmatmul.msk.f32.gmra.mxu3 %vm2043_vm4, %v2042_v52  ;;  %2929 = vmatmul.msk.f32.gmra.mxu1 %vm2043_vm4, %v2115_v16  ;;  %v2952_v14 = vld [vmem:[%s4863_s13 + $0x50] sm:$0xff]  ;;  %v2951_v52 = vld [vmem:[%s4863_s13 + $0x48] sm:$0xff]  ;;  %v2279_v16 = vld [vmem:[%s4863_s13] sm:$0xff] }
 0x4dd   : > { %v2092_v35 = vpop.f32.mrf.mxu2 }
 0x4e2   : > { %v2137_v62 = vpop.f32.mrf.mxu1 }
 0x4e5   : > { %v2095_v47 = vpop.f32.mrf.mxu2 }
 0x4e8   : > { %v2065_v58 = vpop.f32.mrf.mxu3 }
 0x4e9   : > { %v2093_v46 = vadd.f32 %v2092_v35, %v2065_v58  ;;  %v2984_v35 = vld [vmem:[%s4863_s13 + $0x138] sm:$0xff]  ;;  %v2992_v58 = vld [vmem:[%s4863_s13 + $0x170] sm:$0xff] }
 0x4ea   : > { %v2140_v4 = vpop.f32.mrf.mxu1  ;;  %2430 = vmatpush.msrb.mxu2 %v2984_v35  ;;  %2464 = vmatpush.msra.mxu1 %v2992_v58  ;;  %v2544_v35 = vld [vmem:[%s4865_s15 + $0x8] sm:$0xff]  ;;  %v2278_v58 = vld [vmem:[%s4864_s14] sm:$0x1] }
 0x4eb   : > { %v2143_v0 = vadd.f32 %v2137_v62, %v2093_v46  ;;  %v2982_v62 = vld [vmem:[%s4863_s13 + $0x128] sm:$0xff]  ;;  %v2980_v46 = vld [vmem:[%s4863_s13 + $0x118] sm:$0xff] }
 0x4ec   : > { %2431 = vmatpush.msrb.mxu2 %v2983_v54  ;;  %2465 = vmatpush.msra.mxu1 %v2991_v33 }
 0x4ed   : > { %v2149_v40 = vadd.f32 %v3079_v44, %v2143_v0  ;;  %v2978_v0 = vld [vmem:[%s4863_s13 + $0x108] sm:$0xff] }
 0x4ee   : > { %2432 = vmatpush.msrb.mxu2 %v2982_v62  ;;  %2466 = vmatpush.msra.mxu1 %v2990_v31 }
 0x4ef   : > { %v2151_v42 = vmax.f32 %v2149_v40, 0.0  ;;  %v2558_v40 = vld [vmem:[%s4865_s15 + $0x78] sm:$0xff] }
 0x4f0   : > { %v2068_v51 = vpop.f32.mrf.mxu3  ;;  %2433 = vmatpush.msrb.mxu2 %v2981_v59  ;;  %2467 = vmatpush.msra.mxu1 %v2989_v49 }
 0x4f1   : > { %v2096_v1 = vadd.f32 %v2095_v47, %v2068_v51  ;;  %v2988_v51 = vld [vmem:[%s4863_s13 + $0x150] sm:$0xff]  ;;  %v2960_v47 = vld [vmem:[%s4863_s13 + $0x88] sm:$0xff] }
 0x4f2   : > { %2434 = vmatpush.msrb.mxu2 %v2980_v46  ;;  %2468 = vmatpush.msra.mxu1 %v2988_v51 }
 0x4f3   : > { %v2144_v7 = vadd.f32 %v2140_v4, %v2096_v1  ;;  %v2959_v1 = vld [vmem:[%s4863_s13 + $0x80] sm:$0xff]  ;;  %v2969_v4 = vld [vmem:[%s4863_s13 + $0xc8] sm:$0xff] }
 0x4f4   : > { %2435 = vmatpush.msrb.mxu2 %v2979_v45 }
 0x4f5   : > { %v2150_v38 = vadd.f32 %v3079_v44, %v2144_v7  ;;  %v2987_v44 = vld [vmem:[%s4863_s13 + $0x148] sm:$0xff]  ;;  %v2986_v7 = vld [vmem:[%s4863_s13 + $0x140] sm:$0xff] }
 0x4f6   : > { %2436 = vmatpush.msrb.mxu2 %v2978_v0  ;;  %2469 = vmatpush.msra.mxu1 %v2987_v44 }
 0x4f7   : > { %v2152_v2 = vmax.f32 %v2150_v38, 0.0  ;;  %v2557_v38 = vld [vmem:[%s4865_s15 + $0x70] sm:$0xff] }
 0x4f8   : > { %2437 = vmatpush.msrb.mxu2 %v2977_v5  ;;  %2470 = vmatpush.msra.mxu1 %v2986_v7 }
 0x4f9   : > { %2172 = vmatpush.msrb.mxu3 %v2152_v2  ;;  %2197 = vmatpush.msrb.mxu0 %v2152_v2  ;;  %v2556_v2 = vld [vmem:[%s4865_s15 + $0x68] sm:$0xff] }
 0x4fb   : > { %2173 = vmatpush.msrb.mxu3 %v2151_v42  ;;  %2198 = vmatpush.msrb.mxu0 %v2151_v42  ;;  %v2555_v42 = vld [vmem:[%s4865_s15 + $0x60] sm:$0xff] }
 0x4fc   : > { %2930 = vmatmul.msk.f32.vlgmr.msrb.gmra.mxu3 %vm2154_vm5, %v2153_v9  ;;  %2932 = vmatmul.msk.f32.vlgmr.msrb.gmra.mxu0 %vm2154_vm5, %v2931_v10 }
 0x4fd   : > { %2298 = vmatpush.msra.mxu3 %v2286_v3  ;;  %2331 = vmatpush.msra.mxu0 %v2957_v53  ;;  %v3000_v3 = vld [vmem:[%s4863_s13 + $0x1a8] sm:$0xff]  ;;  %v2999_v53 = vld [vmem:[%s4863_s13 + $0x1a0] sm:$0xff] }
 0x4ff   : > { %2299 = vmatpush.msra.mxu3 %v2285_v32  ;;  %2332 = vmatpush.msra.mxu0 %v2956_v13  ;;  %v3010_v32 = vld [vmem:[%s4863_s13 + $0x1f0] sm:$0xff] }
 0x501   : > { %2300 = vmatpush.msra.mxu3 %v2284_v63  ;;  %2333 = vmatpush.msra.mxu0 %v2955_v30  ;;  %v3009_v63 = vld [vmem:[%s4863_s13 + $0x1e8] sm:$0xff]  ;;  %v2998_v30 = vld [vmem:[%s4863_s13 + $0x198] sm:$0xff] }
 0x503   : > { %2301 = vmatpush.msra.mxu3 %v2283_v48  ;;  %2334 = vmatpush.msra.mxu0 %v2954_v60  ;;  %v3008_v48 = vld [vmem:[%s4863_s13 + $0x1e0] sm:$0xff]  ;;  %v2997_v60 = vld [vmem:[%s4863_s13 + $0x190] sm:$0xff] }
 0x505   : > { %2302 = vmatpush.msra.mxu3 %v2282_v28  ;;  %2335 = vmatpush.msra.mxu0 %v2953_v43  ;;  %v3007_v43 = vld [vmem:[%s4863_s13 + $0x1d8] sm:$0xff] }
 0x507   : > { %2303 = vmatpush.msra.mxu3 %v2281_v56  ;;  %2336 = vmatpush.msra.mxu0 %v2952_v14  ;;  %v2996_v56 = vld [vmem:[%s4863_s13 + $0x188] sm:$0xff]  ;;  %v3006_v14 = vld [vmem:[%s4863_s13 + $0x1d0] sm:$0xff] }
 0x509   : > { %2304 = vmatpush.msra.mxu3 %v2280_v15  ;;  %2337 = vmatpush.msra.mxu0 %v2951_v52  ;;  %v2995_v15 = vld [vmem:[%s4863_s13 + $0x180] sm:$0xff]  ;;  %v3005_v52 = vld [vmem:[%s4863_s13 + $0x1c8] sm:$0xff] }
 0x50b   : > { %2305 = vmatpush.msra.mxu3 %v2279_v16  ;;  %2338 = vmatpush.msra.mxu0 %v2950_v20 }
 0x50d   : > { %2364 = vmatpush.msrb.mxu3 %v2966_v19  ;;  %2397 = vmatpush.msrb.mxu0 %v2975_v21  ;;  %v3004_v19 = vld [vmem:[%s4863_s13 + $0x1c0] sm:$0xff]  ;;  %v2554_v21 = vld [vmem:[%s4865_s15 + $0x58] sm:$0xff] }
 0x50f   : > { %2365 = vmatpush.msrb.mxu3 %v2965_v22  ;;  %2398 = vmatpush.msrb.mxu0 %v2974_v23  ;;  %v2553_v22 = vld [vmem:[%s4865_s15 + $0x50] sm:$0xff]  ;;  %v2552_v23 = vld [vmem:[%s4865_s15 + $0x48] sm:$0xff] }
 0x511   : > { %2366 = vmatpush.msrb.mxu3 %v2964_v24  ;;  %2399 = vmatpush.msrb.mxu0 %v2973_v50  ;;  %v2551_v24 = vld [vmem:[%s4865_s15 + $0x40] sm:$0xff] }
 0x513   : > { %2367 = vmatpush.msrb.mxu3 %v2963_v25  ;;  %2400 = vmatpush.msrb.mxu0 %v2972_v29  ;;  %v2550_v25 = vld [vmem:[%s4865_s15 + $0x38] sm:$0xff] }
 0x515   : > { %2368 = vmatpush.msrb.mxu3 %v2962_v26  ;;  %2401 = vmatpush.msrb.mxu0 %v2971_v18  ;;  %v2549_v26 = vld [vmem:[%s4865_s15 + $0x30] sm:$0xff] }
 0x517   : > { %2369 = vmatpush.msrb.mxu3 %v2961_v27  ;;  %2402 = vmatpush.msrb.mxu0 %v2970_v55  ;;  %v2548_v27 = vld [vmem:[%s4865_s15 + $0x28] sm:$0xff] }
 0x519   : > { %2370 = vmatpush.msrb.mxu3 %v2960_v47  ;;  %2403 = vmatpush.msrb.mxu0 %v2969_v4  ;;  %v2559_v4 = vld [vmem:[%s4890_s0] sm:$0x1] }
 0x51b   : > { %2371 = vmatpush.msrb.mxu3 %v2959_v1  ;;  %2404 = vmatpush.msrb.mxu0 %v2968_v8 }
 0x579   : > { %v2200_v17 = vpop.f32.mrf.mxu0 }
 0x57f   : > { %v2175_v37 = vpop.f32.mrf.mxu3 }
 0x580   : > { %v2203_v39 = vmax.f32 %v2175_v37, %v2200_v17  ;;  %v2547_v17 = vld [vmem:[%s4865_s15 + $0x20] sm:$0xff]  ;;  %v2546_v37 = vld [vmem:[%s4865_s15 + $0x18] sm:$0xff] }
 0x582   : > { %2236 = vmatmul.f32.vlgmr.msra.gmra.mxu2 %v2203_v39  ;;  %2273 = vmatmul.f32.vlgmr.msrb.gmra.mxu1 %v2203_v39  ;;  %v2545_v39 = vld [vmem:[%s4865_s15 + $0x10] sm:$0xff] }
 0x583   : > { %2560 = vmatpush.msra.mxu2 %v2558_v40 }
 0x585   : > { %2561 = vmatpush.msra.mxu2 %v2557_v38 }
 0x587   : > { %2562 = vmatpush.msra.mxu2 %v2556_v2 }
 0x589   : > { %2563 = vmatpush.msra.mxu2 %v2555_v42 }
 0x58b   : > { %2564 = vmatpush.msra.mxu2 %v2554_v21 }
 0x58d   : > { %2565 = vmatpush.msra.mxu2 %v2553_v22 }
 0x58f   : > { %2566 = vmatpush.msra.mxu2 %v2552_v23 }
 0x591   : > { %2567 = vmatpush.msra.mxu2 %v2551_v24 }
 0x593   : > { %2568 = vmatpush.msra.mxu2 %v2550_v25 }
 0x595   : > { %2569 = vmatpush.msra.mxu2 %v2549_v26 }
 0x597   : > { %2570 = vmatpush.msra.mxu2 %v2548_v27 }
 0x599   : > { %2571 = vmatpush.msra.mxu2 %v2547_v17 }
 0x59b   : > { %2572 = vmatpush.msra.mxu2 %v2546_v37 }
 0x59d   : > { %2573 = vmatpush.msra.mxu2 %v2545_v39 }
 0x59f   : > { %2574 = vmatpush.msra.mxu2 %v2544_v35 }
 0x5a1   : > { %2575 = vmatpush.msra.mxu2 %v2543_v41 }
 0x5ff   : > { %v2274_v10 = vpop.f32.mrf.mxu1 }
 0x605   : > { %v2237_v9 = vpop.f32.mrf.mxu2 }
 0x606   : > { %v2277_v36 = vmax.f32 %v2237_v9, %v2274_v10 }
 0x608   : > { %2949 = vmatmul.msk.f32.vlgmr.msra.gmra.mxu3 %vm615_vm1, %v2277_v36  ;;  %v2320_v11 = vrot.slane %v2277_v36, 1  ;;  %v2419_v34 = vrot.slane %v2277_v36, 4  ;;  %v2452_v57 = vrot.slane %v2277_v36, 5  ;;  %v2353_v13 = vrot.slane %v2277_v36, 2 }
 0x609   : > { %2496 = vmatpush.msra.mxu3 %v3002_v61  ;;  %v2386_v28 = vrot.slane %v2277_v36, 3  ;;  %v2485_v16 = vrot.slane %v2277_v36, 6  ;;  %v2518_v20 = vrot.slane %v2277_v36, 7 }
 0x60a   : > { %2958 = vmatmul.msk.f32.vlgmr.msra.gmra.mxu0 %vm615_vm1, %v2320_v11  ;;  %2985 = vmatmul.msk.f32.vlgmr.msrb.gmra.mxu2 %vm615_vm1, %v2419_v34 }
 0x60b   : > { %2497 = vmatpush.msra.mxu3 %v3001_v6  ;;  %2529 = vmatpush.msra.mxu0 %v3011_v12 }
 0x60c   : > { %2994 = vmatmul.msk.f32.vlgmr.msra.gmra.mxu1 %vm615_vm1, %v2452_v57 }
 0x60d   : > { %2498 = vmatpush.msra.mxu3 %v3000_v3  ;;  %2530 = vmatpush.msra.mxu0 %v3010_v32 }
 0x60f   : > { %2499 = vmatpush.msra.mxu3 %v2999_v53  ;;  %2531 = vmatpush.msra.mxu0 %v3009_v63 }
 0x610   : > { %2967 = vmatmul.msk.f32.vlgmr.msrb.gmra.mxu3 %vm615_vm1, %v2353_v13 }
 0x611   : > { %2500 = vmatpush.msra.mxu3 %v2998_v30  ;;  %2532 = vmatpush.msra.mxu0 %v3008_v48 }
 0x612   : > { %2976 = vmatmul.msk.f32.vlgmr.msrb.gmra.mxu0 %vm615_vm1, %v2386_v28 }
 0x613   : > { %2501 = vmatpush.msra.mxu3 %v2997_v60  ;;  %2533 = vmatpush.msra.mxu0 %v3007_v43 }
 0x615   : > { %2502 = vmatpush.msra.mxu3 %v2996_v56  ;;  %2534 = vmatpush.msra.mxu0 %v3006_v14 }
 0x617   : > { %2503 = vmatpush.msra.mxu3 %v2995_v15  ;;  %2535 = vmatpush.msra.mxu0 %v3005_v52 }
 0x618   : > { %3003 = vmatmul.msk.f32.vlgmr.msra.gmra.mxu3 %vm615_vm1, %v2485_v16 }
 0x619   : > { %2536 = vmatpush.msra.mxu0 %v3004_v19 }
 0x61a   : > { %3012 = vmatmul.msk.f32.vlgmr.msra.gmra.mxu0 %vm615_vm1, %v2518_v20 }
 0x687   : > { %v2340_v54 = vpop.f32.mrf.mxu0 }
 0x689   : > { %v2472_v45 = vpop.f32.mrf.mxu1 }
 0x68b   : > { %v2307_v62 = vpop.f32.mrf.mxu3 }
 0x68c   : > { %v2310_v33 = vadd.f32 %v2307_v62, %v2278_v58 }
 0x68d   : > { %v2439_v49 = vpop.f32.mrf.mxu2 }
 0x68e   : > { %v2343_v50 = vadd.f32 %v2340_v54, %v2310_v33 }
 0x68f   : > { %v2406_v31 = vpop.f32.mrf.mxu0 }
 0x693   : > { %v2373_v59 = vpop.f32.mrf.mxu3 }
 0x694   : > { %v2376_v29 = vadd.f32 %v2373_v59, %v2343_v50 }
 0x696   : > { %v2409_v46 = vadd.f32 %v2406_v31, %v2376_v29 }
 0x697   : > { %v2538_v0 = vpop.f32.mrf.mxu0 }
 0x698   : > { %v2442_v18 = vadd.f32 %v2439_v49, %v2409_v46 }
 0x69a   : > { %v2475_v51 = vadd.f32 %v2472_v45, %v2442_v18 }
 0x69b   : > { %v2505_v47 = vpop.f32.mrf.mxu3 }
 0x69c   : > { %v2508_v55 = vadd.f32 %v2505_v47, %v2475_v51 }
 0x69e   : > { %v2541_v44 = vadd.f32 %v2538_v0, %v2508_v55 }
 0x6a0   : > { %v2542_v1 = vmax.f32 %v2541_v44, 0.0 }
 0x6a2   : > { %2576 = vmatmul.f32.vlgmr.msra.gmra.mxu2 %v2542_v1 }
 0x725   : > { %v2577_v5 = vpop.f32.mrf.mxu2 }
 0x726   : > { %v2578_v7 = vadd.f32 %v2577_v5, %v2559_v4 }
 0x728   : > { %2580 = vst [vmem:[%s540_s20] sm:$0x1] %v2578_v7 }
 0x729   : > { %3107 = shalt.err (!%p3104_p3)
}
 0x72a   : > { %3040 = dma.vmem_to_hbm [thread:$0]  (%p3272_p5), %s2593_s24, 16, %s2595_s21, %s2582_s27  }
 0x72b PF: > { %s4891_s22 = sld [smem:[#allocation7_spill]] }
 0x72c   : > { %s4892_s16 = sld [smem:[#allocation5_spill]] }
 0x731   : > { %p3046_p4 = scmp.ge.s32.totalorder %s4891_s22, 2 }
 0x732   : > { %s2606_s20 = sand.u32 1, %s4892_s16  }
 0x733   : > { %p3043_p7 = pnand %p3046_p4, %p3276_p6  ;;  %s2607_s28 = scalar_lea.sflag [#allocation3], %s2606_s20 }
 0x735   : > { %p3044_p8 = pneg %p3043_p7 }
 0x737   : > { %3125 = dma.done.wait (%p3044_p8), %s2607_s28, 16  }
 0x738   : > { %3127 = vsyncadd (%p3044_p8), %s2607_s28, 4294967280  ;;  %s4894_s27 = sld [smem:[#allocation8_spill]]  ;;  %s4897_s24 = smov %s3134_s25 }
 0x739   : > { %s4895_s2 = sld [smem:[#allocation6_spill]] }
 0x73a   : > { %s4896_s26 = sld [smem:[#allocation9_spill]] }
 0x73e   : > { %p27_p9 = scmp.ge.s32.totalorder %s4894_s27, 4  }
 0x73f   : > { %s4898_s25 = smov %s4895_s2 }
 0x740   :  { %29 = sbr.rel (!%p27_p9) target bundleno = 8 (0x8), region = 142 }
 0x745   :  { %2612 = vsyncpa [#allocation3], 1 }
 0x746   :  { %2614 = vsyncpa [#allocation3 + $0x1], 1 }

</bundles_post_ra>
